<compile_context>
chip_gen: v7x
topology: tpu7x:2x2x1
jax: 0.10.0
libtpu: 0.0.40
codegen_flags: <defaults>
</compile_context>

<pallas_src>
import functools
import math

import jax
import jax.numpy as jnp
from jax.experimental import pallas as pl
from jax.experimental.pallas import tpu as pltpu


# ----------------------------- in-kernel helpers -----------------------------

def _erf(x):
    # Abramowitz & Stegun 7.1.26 polynomial (|err| < 1.5e-7): lets the *exact*
    # (erf-based) nn.GELU lower with only exp/mul/add/where on Mosaic.
    p = 0.3275911
    a1, a2, a3, a4, a5 = (0.254829592, -0.284496736, 1.421413741,
                          -1.453152027, 1.061405429)
    s = jnp.where(x < 0.0, -1.0, 1.0)
    z = jnp.abs(x)
    t = 1.0 / (1.0 + p * z)
    poly = t * (a1 + t * (a2 + t * (a3 + t * (a4 + t * a5))))
    return s * (1.0 - poly * jnp.exp(-z * z))


def _gelu(x):
    # nn.GELU() default == exact erf-based GELU.
    return 0.5 * x * (1.0 + _erf(x * (1.0 / math.sqrt(2.0))))


def _layernorm(x, w, b, eps=1e-5):
    mu = jnp.mean(x, axis=-1, keepdims=True)
    var = jnp.mean((x - mu) ** 2, axis=-1, keepdims=True)
    return (x - mu) * jax.lax.rsqrt(var + eps) * w + b


# ------------------------------- Pallas kernels -------------------------------

def _encoder_stack_kernel(x_ref, wqkv_ref, bqkv_ref, wp_ref, bp_ref,
                          ln1w_ref, ln1b_ref, w1_ref, b1_ref, w2_ref, b2_ref,
                          ln2w_ref, ln2b_ref, o_ref, act_ref,
                          *, heads, head_dim):
    f32 = jnp.float32
    bf16 = jnp.bfloat16
    l = pl.program_id(1)
    n_layers = pl.num_programs(1)
    D = heads * head_dim

    # Load activation from HBM only for the first layer; afterwards it stays
    # resident in the VMEM scratch across the (arbitrary) layer axis.
    @pl.when(l == 0)
    def _():
        act_ref[...] = x_ref[0].astype(f32)

    x = act_ref[...]                                            # (T, D) f32
    x_b = x.astype(bf16)

    # Fused QKV projection: one (T, D) @ (D, 3D) MXU matmul (bf16 in, f32 acc).
    qkv = jnp.dot(x_b, wqkv_ref[0], preferred_element_type=f32) + bqkv_ref[0]
    q_all = qkv[:, :D]
    k_all = qkv[:, D:2 * D]
    v_all = qkv[:, 2 * D:]

    inv_norm = 1.0 / (head_dim ** 0.5)

    # Per-head attention with the module's softmax over the *query* axis
    # (torch softmax(dim=1)). Scores are computed transposed (T_k, T_q) so the
    # softmax reduction is a lane reduce; heads are concatenated and projected
    # with a single full-width matmul against wp.
    # NOTE: head_dim-wide lane slices only acceptable at toy D; repack heads
    # before scaling D to production sizes.
    head_outs = []
    for h in range(heads):
        lo = h * head_dim
        q = q_all[:, lo:lo + head_dim].astype(bf16)             # (T, d)
        k = k_all[:, lo:lo + head_dim].astype(bf16)
        v = v_all[:, lo:lo + head_dim].astype(bf16)
        # s_t[k_idx, q_idx] = <k[k_idx], q[q_idx]> / sqrt(d)
        s_t = jax.lax.dot_general(k, q, (((1,), (1,)), ((), ())),
                                  preferred_element_type=f32) * inv_norm
        m = jnp.max(s_t, axis=-1, keepdims=True)
        e = jnp.exp(s_t - m)
        denom = jnp.sum(e, axis=-1, keepdims=True)
        p_t = e * pl.reciprocal(denom, approx=True)
        # TODO(synk): nn.Dropout(p=0.1) on the attention map is stochastic; identity here (eval mode).
        # head_out[q, d] = sum_k p_t[k, q] * v[k, d]   (LHS-transposed matmul)
        head_outs.append(jax.lax.dot_general(p_t.astype(bf16), v,
                                             (((0,), (0,)), ((), ())),
                                             preferred_element_type=f32))
    attn_cat = jnp.concatenate(head_outs, axis=-1)              # (T, D)
    attn = jnp.dot(attn_cat.astype(bf16), wp_ref[0],
                   preferred_element_type=f32) + bp_ref[0]

    # residual + LayerNorm1
    x = x + attn
    x = _layernorm(x, ln1w_ref[0], ln1b_ref[0])

    # MLP: Linear -> GELU -> Linear -> GELU
    h1 = _gelu(jnp.dot(x.astype(bf16), w1_ref[0],
                       preferred_element_type=f32) + b1_ref[0])
    mlp = _gelu(jnp.dot(h1.astype(bf16), w2_ref[0],
                        preferred_element_type=f32) + b2_ref[0])

    # residual + LayerNorm2
    x = x + mlp
    x = _layernorm(x, ln2w_ref[0], ln2b_ref[0])

    act_ref[...] = x

    @pl.when(l == n_layers - 1)
    def _():
        o_ref[0] = x.astype(o_ref.dtype)


def _linear_kernel(x_ref, w_ref, b_ref, o_ref):
    f32 = jnp.float32
    y = jnp.dot(x_ref[...].astype(jnp.bfloat16), w_ref[...],
                preferred_element_type=f32) + b_ref[...]
    o_ref[...] = y.astype(o_ref.dtype)


# --------------------------------- wrappers -----------------------------------

def encoder_stack(x, p, *, heads):
    """Runs all N encoder layers in a single fused pallas_call."""
    B, T, D = x.shape
    L = p["wqkv"].shape[0]
    assert D % heads == 0

    def wspec(arr):
        # per-layer weight block: (1, r, c), indexed by the layer grid axis.
        return pl.BlockSpec((1,) + arr.shape[1:], lambda b, l: (l, 0, 0))

    weights = (p["wqkv"], p["bqkv"], p["wp"], p["bp"], p["ln1w"], p["ln1b"],
               p["w1"], p["b1"], p["w2"], p["b2"], p["ln2w"], p["ln2b"])

    return pl.pallas_call(
        functools.partial(_encoder_stack_kernel, heads=heads,
                          head_dim=D // heads),
        out_shape=jax.ShapeDtypeStruct((B, T, D), x.dtype),
        grid=(B, L),
        in_specs=[pl.BlockSpec((1, T, D), lambda b, l: (b, 0, 0))]
                 + [wspec(w) for w in weights],
        out_specs=pl.BlockSpec((1, T, D), lambda b, l: (b, 0, 0)),
        scratch_shapes=[pltpu.VMEM((T, D), jnp.float32)],
        compiler_params=pltpu.CompilerParams(
            dimension_semantics=("parallel", "arbitrary"),
            vmem_limit_bytes=32 * 1024 * 1024),
    )(x, *weights)


def token_prediction(x, w, b):
    """Final linear on flattened (B*T, D) rows; vocab already lane-padded."""
    B, T, D = x.shape
    Vp = w.shape[1]
    x2 = x.reshape(B * T, D)
    out = pl.pallas_call(
        _linear_kernel,
        out_shape=jax.ShapeDtypeStruct((B * T, Vp), x.dtype),
        grid=(1,),
        in_specs=[pl.BlockSpec((B * T, D), lambda i: (0, 0)),
                  pl.BlockSpec((D, Vp), lambda i: (0, 0)),
                  pl.BlockSpec((1, Vp), lambda i: (0, 0))],
        out_specs=pl.BlockSpec((B * T, Vp), lambda i: (0, 0)),
    )(x2, w, b)
    return out.reshape(B, T, Vp)


def bidirectional_transformer(tokens, params, *, heads, codebook_size):
    # tok_emb(x) + pos_emb[:, :t, :]  (glue: embedding gather in plain JAX)
    emb = jnp.take(params["tok_emb"], tokens, axis=0)           # (B, T, D)
    t = tokens.shape[1]
    emb = emb + params["pos_emb"][:, :t, :]
    emb = encoder_stack(emb, params, heads=heads)
    logits = token_prediction(emb, params["tp_w"], params["tp_b"])
    return logits[:, :, :codebook_size]                         # drop lane padding


# ------------------------------ parameter init --------------------------------

def init_params(key, *, n_layers, dim, heads, hidden_dim, codebook_size,
                max_len=512):
    f32, bf16 = jnp.float32, jnp.bfloat16

    def trunc_normal(k, shape, std=0.02):
        # mirrors nn.init.trunc_normal_(w, 0.0, 0.02)
        return (std * jax.random.truncated_normal(k, -2.0, 2.0, shape)).astype(f32)

    def bias(k, shape, fan_in):
        bound = 1.0 / math.sqrt(fan_in)
        return jax.random.uniform(k, shape, f32, -bound, bound)

    keys = jax.random.split(key, 4 + n_layers)

    acc = {n: [] for n in ("wqkv", "bqkv", "wp", "bp", "ln1w", "ln1b",
                           "w1", "b1", "w2", "b2", "ln2w", "ln2b")}
    for i in range(n_layers):
        k = jax.random.split(keys[4 + i], 12)
        # per-head q/k/v Linear(dim, dim//heads) weights concatenated column-wise,
        # then q|k|v fused column-wise into a single (dim, 3*dim) matrix.
        wq = trunc_normal(k[0], (dim, dim)); bq = bias(k[1], (1, dim), dim)
        wk = trunc_normal(k[2], (dim, dim)); bk = bias(k[3], (1, dim), dim)
        wv = trunc_normal(k[4], (dim, dim)); bv = bias(k[5], (1, dim), dim)
        acc["wqkv"].append(jnp.concatenate([wq, wk, wv], axis=1))
        acc["bqkv"].append(jnp.concatenate([bq, bk, bv], axis=1))
        acc["wp"].append(trunc_normal(k[6], (dim, dim)))
        acc["bp"].append(bias(k[7], (1, dim), dim))
        acc["ln1w"].append(jnp.ones((1, dim), f32))
        acc["ln1b"].append(jnp.zeros((1, dim), f32))
        acc["w1"].append(trunc_normal(k[8], (dim, hidden_dim)))
        acc["b1"].append(bias(k[9], (1, hidden_dim), dim))
        acc["w2"].append(trunc_normal(k[10], (hidden_dim, dim)))
        acc["b2"].append(bias(k[11], (1, dim), hidden_dim))
        acc["ln2w"].append(jnp.ones((1, dim), f32))
        acc["ln2b"].append(jnp.zeros((1, dim), f32))

    def stack(name, dt):
        return jnp.stack(acc[name], axis=0).astype(dt)

    # matmul weights stored bf16 (f32 accumulate in-kernel); biases / LN in f32.
    params = {
        "tok_emb": jax.random.normal(keys[0], (codebook_size, dim), f32),
        "pos_emb": jnp.zeros((1, max_len, dim), f32),
        "wqkv": stack("wqkv", bf16), "bqkv": stack("bqkv", f32),
        "wp": stack("wp", bf16), "bp": stack("bp", f32),
        "ln1w": stack("ln1w", f32), "ln1b": stack("ln1b", f32),
        "w1": stack("w1", bf16), "b1": stack("b1", f32),
        "w2": stack("w2", bf16), "b2": stack("b2", f32),
        "ln2w": stack("ln2w", f32), "ln2b": stack("ln2b", f32),
    }
    # Token_Prediction weights, lane-padded to a multiple of 128 outputs.
    vpad = (-codebook_size) % 128
    tp_w = trunc_normal(keys[1], (dim, codebook_size))
    tp_b = bias(keys[2], (1, codebook_size), dim)
    params["tp_w"] = jnp.pad(tp_w, ((0, 0), (0, vpad))).astype(bf16)
    params["tp_b"] = jnp.pad(tp_b, ((0, 0), (0, vpad)))
    return params


# ----------------------------------- main --------------------------------------

if __name__ == "__main__":
    # Small shapes consistent with the module: tokens (B, T) of codebook indices.
    B, T = 2, 8
    N_LAYERS, DIM, HEADS = 2, 32, 8          # dim // heads = 4
    HIDDEN, CODEBOOK = 128, 64

    key = jax.random.PRNGKey(0)
    k_params, k_tokens = jax.random.split(key)

    params = init_params(k_params, n_layers=N_LAYERS, dim=DIM, heads=HEADS,
                         hidden_dim=HIDDEN, codebook_size=CODEBOOK)
    tokens = jax.random.randint(k_tokens, (B, T), 0, CODEBOOK, dtype=jnp.int32)

    fwd = jax.jit(functools.partial(bidirectional_transformer,
                                    heads=HEADS, codebook_size=CODEBOOK))
    logits = fwd(tokens, params)
    logits = jax.block_until_ready(logits)

    assert logits.shape == (B, T, CODEBOOK), logits.shape
    assert logits.dtype == jnp.float32
    assert bool(jnp.all(jnp.isfinite(logits)))
    print("KERNEL_OK")
</pallas_src>

<mosaic_0001>
module attributes {stable_mosaic.version = 11 : i64} {
  func.func @_linear_kernel(%arg0: i32, %arg1: memref<16x32xf32, #tpu.memory_space<vmem>>, %arg2: memref<32x128xbf16, #tpu.memory_space<vmem>>, %arg3: memref<1x128xf32, #tpu.memory_space<vmem>>, %arg4: memref<16x128xf32, #tpu.memory_space<vmem>>) attributes {dimension_semantics = [#tpu.dimension_semantics<arbitrary>], iteration_bounds = array<i64: 1>, scalar_prefetch = 0 : i64, scratch_operands = 0 : i64, tpu.core_type = #tpu.core_type<tc>, window_params = [{pipeline_mode = #tpu.pipeline_mode<synchronous>, transform_indices = @transform_0, window_bounds = array<i64: 16, 32>}, {pipeline_mode = #tpu.pipeline_mode<synchronous>, transform_indices = @transform_1, window_bounds = array<i64: 32, 128>}, {pipeline_mode = #tpu.pipeline_mode<synchronous>, transform_indices = @transform_2, window_bounds = array<i64: 1, 128>}, {pipeline_mode = #tpu.pipeline_mode<synchronous>, transform_indices = @transform_3, window_bounds = array<i64: 16, 128>}]} {
    %c0 = arith.constant 0 : index
    %c0_0 = arith.constant 0 : index
    %0 = vector.load %arg1[%c0, %c0_0] : memref<16x32xf32, #tpu.memory_space<vmem>>, vector<16x32xf32>
    %1 = arith.truncf %0 : vector<16x32xf32> to vector<16x32xbf16>
    %c0_1 = arith.constant 0 : index
    %c0_2 = arith.constant 0 : index
    %2 = vector.load %arg2[%c0_1, %c0_2] : memref<32x128xbf16, #tpu.memory_space<vmem>>, vector<32x128xbf16>
    %cst = arith.constant dense<0.000000e+00> : vector<16x128xf32>
    %3 = tpu.matmul %1, %2, %cst {dimension_numbers = #tpu.dot_dimension_numbers<[1], [0], [0], [1], [0, 0, 1, 1], [], []>} : vector<16x32xbf16>, vector<32x128xbf16>, vector<16x128xf32> -> vector<16x128xf32>
    %c0_3 = arith.constant 0 : index
    %c0_4 = arith.constant 0 : index
    %4 = vector.load %arg3[%c0_3, %c0_4] : memref<1x128xf32, #tpu.memory_space<vmem>>, vector<1x128xf32>
    %5 = vector.broadcast %4 : vector<1x128xf32> to vector<16x128xf32>
    %6 = arith.addf %3, %5 : vector<16x128xf32>
    %c0_5 = arith.constant 0 : index
    %c0_6 = arith.constant 0 : index
    %7 = vector.load %arg4[%c0_5, %c0_6] : memref<16x128xf32, #tpu.memory_space<vmem>>, vector<16x128xf32>
    tpu.vector_store %arg4[%c0_5, %c0_6], %6 {strides = array<i32>} : memref<16x128xf32, #tpu.memory_space<vmem>>, vector<16x128xf32>,
    return
  }
  func.func @transform_0(%arg0: i32) -> (i32, i32) {
    %c0_i32 = arith.constant 0 : i32
    %c0_i32_0 = arith.constant 0 : i32
    %c0_i32_1 = arith.constant 0 : i32
    return %c0_i32, %c0_i32_0 : i32, i32
  }
  func.func @transform_1(%arg0: i32) -> (i32, i32) {
    %c0_i32 = arith.constant 0 : i32
    %c0_i32_0 = arith.constant 0 : i32
    %c0_i32_1 = arith.constant 0 : i32
    return %c0_i32, %c0_i32_0 : i32, i32
  }
  func.func @transform_2(%arg0: i32) -> (i32, i32) {
    %c0_i32 = arith.constant 0 : i32
    %c0_i32_0 = arith.constant 0 : i32
    %c0_i32_1 = arith.constant 0 : i32
    return %c0_i32, %c0_i32_0 : i32, i32
  }
  func.func @transform_3(%arg0: i32) -> (i32, i32) {
    %c0_i32 = arith.constant 0 : i32
    %c0_i32_0 = arith.constant 0 : i32
    %c0_i32_1 = arith.constant 0 : i32
    return %c0_i32, %c0_i32_0 : i32, i32
  }
}

module attributes {stable_mosaic.version = 11 : i64} {
  func.func @_encoder_stack_kernel(%arg0: i32, %arg1: i32, %arg2: memref<1x8x32xf32, #tpu.memory_space<vmem>>, %arg3: memref<1x32x96xbf16, #tpu.memory_space<vmem>>, %arg4: memref<1x1x96xf32, #tpu.memory_space<vmem>>, %arg5: memref<1x32x32xbf16, #tpu.memory_space<vmem>>, %arg6: memref<1x1x32xf32, #tpu.memory_space<vmem>>, %arg7: memref<1x1x32xf32, #tpu.memory_space<vmem>>, %arg8: memref<1x1x32xf32, #tpu.memory_space<vmem>>, %arg9: memref<1x32x128xbf16, #tpu.memory_space<vmem>>, %arg10: memref<1x1x128xf32, #tpu.memory_space<vmem>>, %arg11: memref<1x128x32xbf16, #tpu.memory_space<vmem>>, %arg12: memref<1x1x32xf32, #tpu.memory_space<vmem>>, %arg13: memref<1x1x32xf32, #tpu.memory_space<vmem>>, %arg14: memref<1x1x32xf32, #tpu.memory_space<vmem>>, %arg15: memref<1x8x32xf32, #tpu.memory_space<vmem>>, %arg16: memref<8x32xf32, #tpu.memory_space<vmem>>) attributes {dimension_semantics = [#tpu.dimension_semantics<parallel>, #tpu.dimension_semantics<arbitrary>], iteration_bounds = array<i64: 2, 2>, scalar_prefetch = 0 : i64, scratch_operands = 1 : i64, tpu.core_type = #tpu.core_type<tc>, window_params = [{transform_indices = @transform_0, window_bounds = array<i64: 1, 8, 32>}, {transform_indices = @transform_1, window_bounds = array<i64: 1, 32, 96>}, {transform_indices = @transform_2, window_bounds = array<i64: 1, 1, 96>}, {transform_indices = @transform_3, window_bounds = array<i64: 1, 32, 32>}, {transform_indices = @transform_4, window_bounds = array<i64: 1, 1, 32>}, {transform_indices = @transform_5, window_bounds = array<i64: 1, 1, 32>}, {transform_indices = @transform_6, window_bounds = array<i64: 1, 1, 32>}, {transform_indices = @transform_7, window_bounds = array<i64: 1, 32, 128>}, {transform_indices = @transform_8, window_bounds = array<i64: 1, 1, 128>}, {transform_indices = @transform_9, window_bounds = array<i64: 1, 128, 32>}, {transform_indices = @transform_10, window_bounds = array<i64: 1, 1, 32>}, {transform_indices = @transform_11, window_bounds = array<i64: 1, 1, 32>}, {transform_indices = @transform_12, window_bounds = array<i64: 1, 1, 32>}, {transform_indices = @transform_13, window_bounds = array<i64: 1, 8, 32>}]} {
    %c0_i32 = arith.constant 0 : i32
    %0 = arith.cmpi eq, %arg1, %c0_i32 : i32
    %1 = arith.extui %0 : i1 to i32
    %c0_i32_0 = arith.constant 0 : i32
    %2 = arith.cmpi ne, %1, %c0_i32_0 : i32
    scf.if %2 {
      %c0_126 = arith.constant 0 : index
      %c0_127 = arith.constant 0 : index
      %c0_128 = arith.constant 0 : index
      %348 = vector.load %arg2[%c0_126, %c0_127, %c0_128] : memref<1x8x32xf32, #tpu.memory_space<vmem>>, vector<1x8x32xf32>
      %349 = vector.shape_cast %348 : vector<1x8x32xf32> to vector<8x32xf32>
      %c0_129 = arith.constant 0 : index
      %c0_130 = arith.constant 0 : index
      %350 = vector.load %arg16[%c0_129, %c0_130] : memref<8x32xf32, #tpu.memory_space<vmem>>, vector<8x32xf32>
      tpu.vector_store %arg16[%c0_129, %c0_130], %349 {strides = array<i32>} : memref<8x32xf32, #tpu.memory_space<vmem>>, vector<8x32xf32>,
    } else {
    }
    %c0 = arith.constant 0 : index
    %c0_1 = arith.constant 0 : index
    %3 = vector.load %arg16[%c0, %c0_1] : memref<8x32xf32, #tpu.memory_space<vmem>>, vector<8x32xf32>
    %4 = arith.truncf %3 : vector<8x32xf32> to vector<8x32xbf16>
    %c0_2 = arith.constant 0 : index
    %c0_3 = arith.constant 0 : index
    %c0_4 = arith.constant 0 : index
    %5 = vector.load %arg3[%c0_2, %c0_3, %c0_4] : memref<1x32x96xbf16, #tpu.memory_space<vmem>>, vector<1x32x96xbf16>
    %6 = vector.shape_cast %5 : vector<1x32x96xbf16> to vector<32x96xbf16>
    %cst = arith.constant dense<0.000000e+00> : vector<8x96xf32>
    %7 = tpu.matmul %4, %6, %cst {dimension_numbers = #tpu.dot_dimension_numbers<[1], [0], [0], [1], [0, 0, 1, 1], [], []>} : vector<8x32xbf16>, vector<32x96xbf16>, vector<8x96xf32> -> vector<8x96xf32>
    %c0_5 = arith.constant 0 : index
    %c0_6 = arith.constant 0 : index
    %c0_7 = arith.constant 0 : index
    %8 = vector.load %arg4[%c0_5, %c0_6, %c0_7] : memref<1x1x96xf32, #tpu.memory_space<vmem>>, vector<1x1x96xf32>
    %9 = vector.shape_cast %8 : vector<1x1x96xf32> to vector<1x96xf32>
    %10 = vector.broadcast %9 : vector<1x96xf32> to vector<8x96xf32>
    %11 = arith.addf %7, %10 : vector<8x96xf32>
    %12 = vector.extract_strided_slice %11 {offsets = [0, 0], sizes = [8, 32], strides = [1, 1]} : vector<8x96xf32> to vector<8x32xf32>
    %13 = vector.extract_strided_slice %11 {offsets = [0, 32], sizes = [8, 32], strides = [1, 1]} : vector<8x96xf32> to vector<8x32xf32>
    %14 = vector.extract_strided_slice %11 {offsets = [0, 64], sizes = [8, 32], strides = [1, 1]} : vector<8x96xf32> to vector<8x32xf32>
    %15 = vector.extract_strided_slice %12 {offsets = [0, 0], sizes = [8, 4], strides = [1, 1]} : vector<8x32xf32> to vector<8x4xf32>
    %16 = arith.truncf %15 : vector<8x4xf32> to vector<8x4xbf16>
    %17 = vector.extract_strided_slice %13 {offsets = [0, 0], sizes = [8, 4], strides = [1, 1]} : vector<8x32xf32> to vector<8x4xf32>
    %18 = arith.truncf %17 : vector<8x4xf32> to vector<8x4xbf16>
    %19 = vector.extract_strided_slice %14 {offsets = [0, 0], sizes = [8, 4], strides = [1, 1]} : vector<8x32xf32> to vector<8x4xf32>
    %20 = arith.truncf %19 : vector<8x4xf32> to vector<8x4xbf16>
    %cst_8 = arith.constant dense<0.000000e+00> : vector<8x8xf32>
    %21 = tpu.matmul %18, %16, %cst_8 {dimension_numbers = #tpu.dot_dimension_numbers<[1], [1], [0], [0], [0, 0, 1, 0], [], []>} : vector<8x4xbf16>, vector<8x4xbf16>, vector<8x8xf32> -> vector<8x8xf32>
    %cst_9 = arith.constant 5.000000e-01 : f32
    %22 = vector.broadcast %cst_9 : f32 to vector<8x8xf32>
    %23 = arith.mulf %21, %22 : vector<8x8xf32>
    %cst_10 = arith.constant dense<0xFF800000> : vector<8xf32>
    %24 = vector.multi_reduction <maximumf>, %23, %cst_10 [1] : vector<8x8xf32> to vector<8xf32>
    %25 = vector.shape_cast %24 : vector<8xf32> to vector<8x1xf32>
    %26 = vector.broadcast %25 : vector<8x1xf32> to vector<8x8xf32>
    %27 = arith.subf %23, %26 : vector<8x8xf32>
    %28 = math.exp %27 : vector<8x8xf32>
    %cst_11 = arith.constant dense<0.000000e+00> : vector<8xf32>
    %29 = vector.multi_reduction <add>, %28, %cst_11 [1] : vector<8x8xf32> to vector<8xf32>
    %30 = vector.shape_cast %29 : vector<8xf32> to vector<8x1xf32>
    %31 = tpu.reciprocal %30 {approx = true} : vector<8x1xf32> -> vector<8x1xf32>
    %32 = vector.broadcast %31 : vector<8x1xf32> to vector<8x8xf32>
    %33 = arith.mulf %28, %32 : vector<8x8xf32>
    %34 = arith.truncf %33 : vector<8x8xf32> to vector<8x8xbf16>
    %cst_12 = arith.constant dense<0.000000e+00> : vector<8x4xf32>
    %35 = tpu.matmul %34, %20, %cst_12 {dimension_numbers = #tpu.dot_dimension_numbers<[0], [0], [1], [1], [0, 1, 1, 1], [], []>} : vector<8x8xbf16>, vector<8x4xbf16>, vector<8x4xf32> -> vector<8x4xf32>
    %36 = vector.extract_strided_slice %12 {offsets = [0, 4], sizes = [8, 4], strides = [1, 1]} : vector<8x32xf32> to vector<8x4xf32>
    %37 = arith.truncf %36 : vector<8x4xf32> to vector<8x4xbf16>
    %38 = vector.extract_strided_slice %13 {offsets = [0, 4], sizes = [8, 4], strides = [1, 1]} : vector<8x32xf32> to vector<8x4xf32>
    %39 = arith.truncf %38 : vector<8x4xf32> to vector<8x4xbf16>
    %40 = vector.extract_strided_slice %14 {offsets = [0, 4], sizes = [8, 4], strides = [1, 1]} : vector<8x32xf32> to vector<8x4xf32>
    %41 = arith.truncf %40 : vector<8x4xf32> to vector<8x4xbf16>
    %cst_13 = arith.constant dense<0.000000e+00> : vector<8x8xf32>
    %42 = tpu.matmul %39, %37, %cst_13 {dimension_numbers = #tpu.dot_dimension_numbers<[1], [1], [0], [0], [0, 0, 1, 0], [], []>} : vector<8x4xbf16>, vector<8x4xbf16>, vector<8x8xf32> -> vector<8x8xf32>
    %cst_14 = arith.constant 5.000000e-01 : f32
    %43 = vector.broadcast %cst_14 : f32 to vector<8x8xf32>
    %44 = arith.mulf %42, %43 : vector<8x8xf32>
    %cst_15 = arith.constant dense<0xFF800000> : vector<8xf32>
    %45 = vector.multi_reduction <maximumf>, %44, %cst_15 [1] : vector<8x8xf32> to vector<8xf32>
    %46 = vector.shape_cast %45 : vector<8xf32> to vector<8x1xf32>
    %47 = vector.broadcast %46 : vector<8x1xf32> to vector<8x8xf32>
    %48 = arith.subf %44, %47 : vector<8x8xf32>
    %49 = math.exp %48 : vector<8x8xf32>
    %cst_16 = arith.constant dense<0.000000e+00> : vector<8xf32>
    %50 = vector.multi_reduction <add>, %49, %cst_16 [1] : vector<8x8xf32> to vector<8xf32>
    %51 = vector.shape_cast %50 : vector<8xf32> to vector<8x1xf32>
    %52 = tpu.reciprocal %51 {approx = true} : vector<8x1xf32> -> vector<8x1xf32>
    %53 = vector.broadcast %52 : vector<8x1xf32> to vector<8x8xf32>
    %54 = arith.mulf %49, %53 : vector<8x8xf32>
    %55 = arith.truncf %54 : vector<8x8xf32> to vector<8x8xbf16>
    %cst_17 = arith.constant dense<0.000000e+00> : vector<8x4xf32>
    %56 = tpu.matmul %55, %41, %cst_17 {dimension_numbers = #tpu.dot_dimension_numbers<[0], [0], [1], [1], [0, 1, 1, 1], [], []>} : vector<8x8xbf16>, vector<8x4xbf16>, vector<8x4xf32> -> vector<8x4xf32>
    %57 = vector.extract_strided_slice %12 {offsets = [0, 8], sizes = [8, 4], strides = [1, 1]} : vector<8x32xf32> to vector<8x4xf32>
    %58 = arith.truncf %57 : vector<8x4xf32> to vector<8x4xbf16>
    %59 = vector.extract_strided_slice %13 {offsets = [0, 8], sizes = [8, 4], strides = [1, 1]} : vector<8x32xf32> to vector<8x4xf32>
    %60 = arith.truncf %59 : vector<8x4xf32> to vector<8x4xbf16>
    %61 = vector.extract_strided_slice %14 {offsets = [0, 8], sizes = [8, 4], strides = [1, 1]} : vector<8x32xf32> to vector<8x4xf32>
    %62 = arith.truncf %61 : vector<8x4xf32> to vector<8x4xbf16>
    %cst_18 = arith.constant dense<0.000000e+00> : vector<8x8xf32>
    %63 = tpu.matmul %60, %58, %cst_18 {dimension_numbers = #tpu.dot_dimension_numbers<[1], [1], [0], [0], [0, 0, 1, 0], [], []>} : vector<8x4xbf16>, vector<8x4xbf16>, vector<8x8xf32> -> vector<8x8xf32>
    %cst_19 = arith.constant 5.000000e-01 : f32
    %64 = vector.broadcast %cst_19 : f32 to vector<8x8xf32>
    %65 = arith.mulf %63, %64 : vector<8x8xf32>
    %cst_20 = arith.constant dense<0xFF800000> : vector<8xf32>
    %66 = vector.multi_reduction <maximumf>, %65, %cst_20 [1] : vector<8x8xf32> to vector<8xf32>
    %67 = vector.shape_cast %66 : vector<8xf32> to vector<8x1xf32>
    %68 = vector.broadcast %67 : vector<8x1xf32> to vector<8x8xf32>
    %69 = arith.subf %65, %68 : vector<8x8xf32>
    %70 = math.exp %69 : vector<8x8xf32>
    %cst_21 = arith.constant dense<0.000000e+00> : vector<8xf32>
    %71 = vector.multi_reduction <add>, %70, %cst_21 [1] : vector<8x8xf32> to vector<8xf32>
    %72 = vector.shape_cast %71 : vector<8xf32> to vector<8x1xf32>
    %73 = tpu.reciprocal %72 {approx = true} : vector<8x1xf32> -> vector<8x1xf32>
    %74 = vector.broadcast %73 : vector<8x1xf32> to vector<8x8xf32>
    %75 = arith.mulf %70, %74 : vector<8x8xf32>
    %76 = arith.truncf %75 : vector<8x8xf32> to vector<8x8xbf16>
    %cst_22 = arith.constant dense<0.000000e+00> : vector<8x4xf32>
    %77 = tpu.matmul %76, %62, %cst_22 {dimension_numbers = #tpu.dot_dimension_numbers<[0], [0], [1], [1], [0, 1, 1, 1], [], []>} : vector<8x8xbf16>, vector<8x4xbf16>, vector<8x4xf32> -> vector<8x4xf32>
    %78 = vector.extract_strided_slice %12 {offsets = [0, 12], sizes = [8, 4], strides = [1, 1]} : vector<8x32xf32> to vector<8x4xf32>
    %79 = arith.truncf %78 : vector<8x4xf32> to vector<8x4xbf16>
    %80 = vector.extract_strided_slice %13 {offsets = [0, 12], sizes = [8, 4], strides = [1, 1]} : vector<8x32xf32> to vector<8x4xf32>
    %81 = arith.truncf %80 : vector<8x4xf32> to vector<8x4xbf16>
    %82 = vector.extract_strided_slice %14 {offsets = [0, 12], sizes = [8, 4], strides = [1, 1]} : vector<8x32xf32> to vector<8x4xf32>
    %83 = arith.truncf %82 : vector<8x4xf32> to vector<8x4xbf16>
    %cst_23 = arith.constant dense<0.000000e+00> : vector<8x8xf32>
    %84 = tpu.matmul %81, %79, %cst_23 {dimension_numbers = #tpu.dot_dimension_numbers<[1], [1], [0], [0], [0, 0, 1, 0], [], []>} : vector<8x4xbf16>, vector<8x4xbf16>, vector<8x8xf32> -> vector<8x8xf32>
    %cst_24 = arith.constant 5.000000e-01 : f32
    %85 = vector.broadcast %cst_24 : f32 to vector<8x8xf32>
    %86 = arith.mulf %84, %85 : vector<8x8xf32>
    %cst_25 = arith.constant dense<0xFF800000> : vector<8xf32>
    %87 = vector.multi_reduction <maximumf>, %86, %cst_25 [1] : vector<8x8xf32> to vector<8xf32>
    %88 = vector.shape_cast %87 : vector<8xf32> to vector<8x1xf32>
    %89 = vector.broadcast %88 : vector<8x1xf32> to vector<8x8xf32>
    %90 = arith.subf %86, %89 : vector<8x8xf32>
    %91 = math.exp %90 : vector<8x8xf32>
    %cst_26 = arith.constant dense<0.000000e+00> : vector<8xf32>
    %92 = vector.multi_reduction <add>, %91, %cst_26 [1] : vector<8x8xf32> to vector<8xf32>
    %93 = vector.shape_cast %92 : vector<8xf32> to vector<8x1xf32>
    %94 = tpu.reciprocal %93 {approx = true} : vector<8x1xf32> -> vector<8x1xf32>
    %95 = vector.broadcast %94 : vector<8x1xf32> to vector<8x8xf32>
    %96 = arith.mulf %91, %95 : vector<8x8xf32>
    %97 = arith.truncf %96 : vector<8x8xf32> to vector<8x8xbf16>
    %cst_27 = arith.constant dense<0.000000e+00> : vector<8x4xf32>
    %98 = tpu.matmul %97, %83, %cst_27 {dimension_numbers = #tpu.dot_dimension_numbers<[0], [0], [1], [1], [0, 1, 1, 1], [], []>} : vector<8x8xbf16>, vector<8x4xbf16>, vector<8x4xf32> -> vector<8x4xf32>
    %99 = vector.extract_strided_slice %12 {offsets = [0, 16], sizes = [8, 4], strides = [1, 1]} : vector<8x32xf32> to vector<8x4xf32>
    %100 = arith.truncf %99 : vector<8x4xf32> to vector<8x4xbf16>
    %101 = vector.extract_strided_slice %13 {offsets = [0, 16], sizes = [8, 4], strides = [1, 1]} : vector<8x32xf32> to vector<8x4xf32>
    %102 = arith.truncf %101 : vector<8x4xf32> to vector<8x4xbf16>
    %103 = vector.extract_strided_slice %14 {offsets = [0, 16], sizes = [8, 4], strides = [1, 1]} : vector<8x32xf32> to vector<8x4xf32>
    %104 = arith.truncf %103 : vector<8x4xf32> to vector<8x4xbf16>
    %cst_28 = arith.constant dense<0.000000e+00> : vector<8x8xf32>
    %105 = tpu.matmul %102, %100, %cst_28 {dimension_numbers = #tpu.dot_dimension_numbers<[1], [1], [0], [0], [0, 0, 1, 0], [], []>} : vector<8x4xbf16>, vector<8x4xbf16>, vector<8x8xf32> -> vector<8x8xf32>
    %cst_29 = arith.constant 5.000000e-01 : f32
    %106 = vector.broadcast %cst_29 : f32 to vector<8x8xf32>
    %107 = arith.mulf %105, %106 : vector<8x8xf32>
    %cst_30 = arith.constant dense<0xFF800000> : vector<8xf32>
    %108 = vector.multi_reduction <maximumf>, %107, %cst_30 [1] : vector<8x8xf32> to vector<8xf32>
    %109 = vector.shape_cast %108 : vector<8xf32> to vector<8x1xf32>
    %110 = vector.broadcast %109 : vector<8x1xf32> to vector<8x8xf32>
    %111 = arith.subf %107, %110 : vector<8x8xf32>
    %112 = math.exp %111 : vector<8x8xf32>
    %cst_31 = arith.constant dense<0.000000e+00> : vector<8xf32>
    %113 = vector.multi_reduction <add>, %112, %cst_31 [1] : vector<8x8xf32> to vector<8xf32>
    %114 = vector.shape_cast %113 : vector<8xf32> to vector<8x1xf32>
    %115 = tpu.reciprocal %114 {approx = true} : vector<8x1xf32> -> vector<8x1xf32>
    %116 = vector.broadcast %115 : vector<8x1xf32> to vector<8x8xf32>
    %117 = arith.mulf %112, %116 : vector<8x8xf32>
    %118 = arith.truncf %117 : vector<8x8xf32> to vector<8x8xbf16>
    %cst_32 = arith.constant dense<0.000000e+00> : vector<8x4xf32>
    %119 = tpu.matmul %118, %104, %cst_32 {dimension_numbers = #tpu.dot_dimension_numbers<[0], [0], [1], [1], [0, 1, 1, 1], [], []>} : vector<8x8xbf16>, vector<8x4xbf16>, vector<8x4xf32> -> vector<8x4xf32>
    %120 = vector.extract_strided_slice %12 {offsets = [0, 20], sizes = [8, 4], strides = [1, 1]} : vector<8x32xf32> to vector<8x4xf32>
    %121 = arith.truncf %120 : vector<8x4xf32> to vector<8x4xbf16>
    %122 = vector.extract_strided_slice %13 {offsets = [0, 20], sizes = [8, 4], strides = [1, 1]} : vector<8x32xf32> to vector<8x4xf32>
    %123 = arith.truncf %122 : vector<8x4xf32> to vector<8x4xbf16>
    %124 = vector.extract_strided_slice %14 {offsets = [0, 20], sizes = [8, 4], strides = [1, 1]} : vector<8x32xf32> to vector<8x4xf32>
    %125 = arith.truncf %124 : vector<8x4xf32> to vector<8x4xbf16>
    %cst_33 = arith.constant dense<0.000000e+00> : vector<8x8xf32>
    %126 = tpu.matmul %123, %121, %cst_33 {dimension_numbers = #tpu.dot_dimension_numbers<[1], [1], [0], [0], [0, 0, 1, 0], [], []>} : vector<8x4xbf16>, vector<8x4xbf16>, vector<8x8xf32> -> vector<8x8xf32>
    %cst_34 = arith.constant 5.000000e-01 : f32
    %127 = vector.broadcast %cst_34 : f32 to vector<8x8xf32>
    %128 = arith.mulf %126, %127 : vector<8x8xf32>
    %cst_35 = arith.constant dense<0xFF800000> : vector<8xf32>
    %129 = vector.multi_reduction <maximumf>, %128, %cst_35 [1] : vector<8x8xf32> to vector<8xf32>
    %130 = vector.shape_cast %129 : vector<8xf32> to vector<8x1xf32>
    %131 = vector.broadcast %130 : vector<8x1xf32> to vector<8x8xf32>
    %132 = arith.subf %128, %131 : vector<8x8xf32>
    %133 = math.exp %132 : vector<8x8xf32>
    %cst_36 = arith.constant dense<0.000000e+00> : vector<8xf32>
    %134 = vector.multi_reduction <add>, %133, %cst_36 [1] : vector<8x8xf32> to vector<8xf32>
    %135 = vector.shape_cast %134 : vector<8xf32> to vector<8x1xf32>
    %136 = tpu.reciprocal %135 {approx = true} : vector<8x1xf32> -> vector<8x1xf32>
    %137 = vector.broadcast %136 : vector<8x1xf32> to vector<8x8xf32>
    %138 = arith.mulf %133, %137 : vector<8x8xf32>
    %139 = arith.truncf %138 : vector<8x8xf32> to vector<8x8xbf16>
    %cst_37 = arith.constant dense<0.000000e+00> : vector<8x4xf32>
    %140 = tpu.matmul %139, %125, %cst_37 {dimension_numbers = #tpu.dot_dimension_numbers<[0], [0], [1], [1], [0, 1, 1, 1], [], []>} : vector<8x8xbf16>, vector<8x4xbf16>, vector<8x4xf32> -> vector<8x4xf32>
    %141 = vector.extract_strided_slice %12 {offsets = [0, 24], sizes = [8, 4], strides = [1, 1]} : vector<8x32xf32> to vector<8x4xf32>
    %142 = arith.truncf %141 : vector<8x4xf32> to vector<8x4xbf16>
    %143 = vector.extract_strided_slice %13 {offsets = [0, 24], sizes = [8, 4], strides = [1, 1]} : vector<8x32xf32> to vector<8x4xf32>
    %144 = arith.truncf %143 : vector<8x4xf32> to vector<8x4xbf16>
    %145 = vector.extract_strided_slice %14 {offsets = [0, 24], sizes = [8, 4], strides = [1, 1]} : vector<8x32xf32> to vector<8x4xf32>
    %146 = arith.truncf %145 : vector<8x4xf32> to vector<8x4xbf16>
    %cst_38 = arith.constant dense<0.000000e+00> : vector<8x8xf32>
    %147 = tpu.matmul %144, %142, %cst_38 {dimension_numbers = #tpu.dot_dimension_numbers<[1], [1], [0], [0], [0, 0, 1, 0], [], []>} : vector<8x4xbf16>, vector<8x4xbf16>, vector<8x8xf32> -> vector<8x8xf32>
    %cst_39 = arith.constant 5.000000e-01 : f32
    %148 = vector.broadcast %cst_39 : f32 to vector<8x8xf32>
    %149 = arith.mulf %147, %148 : vector<8x8xf32>
    %cst_40 = arith.constant dense<0xFF800000> : vector<8xf32>
    %150 = vector.multi_reduction <maximumf>, %149, %cst_40 [1] : vector<8x8xf32> to vector<8xf32>
    %151 = vector.shape_cast %150 : vector<8xf32> to vector<8x1xf32>
    %152 = vector.broadcast %151 : vector<8x1xf32> to vector<8x8xf32>
    %153 = arith.subf %149, %152 : vector<8x8xf32>
    %154 = math.exp %153 : vector<8x8xf32>
    %cst_41 = arith.constant dense<0.000000e+00> : vector<8xf32>
    %155 = vector.multi_reduction <add>, %154, %cst_41 [1] : vector<8x8xf32> to vector<8xf32>
    %156 = vector.shape_cast %155 : vector<8xf32> to vector<8x1xf32>
    %157 = tpu.reciprocal %156 {approx = true} : vector<8x1xf32> -> vector<8x1xf32>
    %158 = vector.broadcast %157 : vector<8x1xf32> to vector<8x8xf32>
    %159 = arith.mulf %154, %158 : vector<8x8xf32>
    %160 = arith.truncf %159 : vector<8x8xf32> to vector<8x8xbf16>
    %cst_42 = arith.constant dense<0.000000e+00> : vector<8x4xf32>
    %161 = tpu.matmul %160, %146, %cst_42 {dimension_numbers = #tpu.dot_dimension_numbers<[0], [0], [1], [1], [0, 1, 1, 1], [], []>} : vector<8x8xbf16>, vector<8x4xbf16>, vector<8x4xf32> -> vector<8x4xf32>
    %162 = vector.extract_strided_slice %12 {offsets = [0, 28], sizes = [8, 4], strides = [1, 1]} : vector<8x32xf32> to vector<8x4xf32>
    %163 = arith.truncf %162 : vector<8x4xf32> to vector<8x4xbf16>
    %164 = vector.extract_strided_slice %13 {offsets = [0, 28], sizes = [8, 4], strides = [1, 1]} : vector<8x32xf32> to vector<8x4xf32>
    %165 = arith.truncf %164 : vector<8x4xf32> to vector<8x4xbf16>
    %166 = vector.extract_strided_slice %14 {offsets = [0, 28], sizes = [8, 4], strides = [1, 1]} : vector<8x32xf32> to vector<8x4xf32>
    %167 = arith.truncf %166 : vector<8x4xf32> to vector<8x4xbf16>
    %cst_43 = arith.constant dense<0.000000e+00> : vector<8x8xf32>
    %168 = tpu.matmul %165, %163, %cst_43 {dimension_numbers = #tpu.dot_dimension_numbers<[1], [1], [0], [0], [0, 0, 1, 0], [], []>} : vector<8x4xbf16>, vector<8x4xbf16>, vector<8x8xf32> -> vector<8x8xf32>
    %cst_44 = arith.constant 5.000000e-01 : f32
    %169 = vector.broadcast %cst_44 : f32 to vector<8x8xf32>
    %170 = arith.mulf %168, %169 : vector<8x8xf32>
    %cst_45 = arith.constant dense<0xFF800000> : vector<8xf32>
    %171 = vector.multi_reduction <maximumf>, %170, %cst_45 [1] : vector<8x8xf32> to vector<8xf32>
    %172 = vector.shape_cast %171 : vector<8xf32> to vector<8x1xf32>
    %173 = vector.broadcast %172 : vector<8x1xf32> to vector<8x8xf32>
    %174 = arith.subf %170, %173 : vector<8x8xf32>
    %175 = math.exp %174 : vector<8x8xf32>
    %cst_46 = arith.constant dense<0.000000e+00> : vector<8xf32>
    %176 = vector.multi_reduction <add>, %175, %cst_46 [1] : vector<8x8xf32> to vector<8xf32>
    %177 = vector.shape_cast %176 : vector<8xf32> to vector<8x1xf32>
    %178 = tpu.reciprocal %177 {approx = true} : vector<8x1xf32> -> vector<8x1xf32>
    %179 = vector.broadcast %178 : vector<8x1xf32> to vector<8x8xf32>
    %180 = arith.mulf %175, %179 : vector<8x8xf32>
    %181 = arith.truncf %180 : vector<8x8xf32> to vector<8x8xbf16>
    %cst_47 = arith.constant dense<0.000000e+00> : vector<8x4xf32>
    %182 = tpu.matmul %181, %167, %cst_47 {dimension_numbers = #tpu.dot_dimension_numbers<[0], [0], [1], [1], [0, 1, 1, 1], [], []>} : vector<8x8xbf16>, vector<8x4xbf16>, vector<8x4xf32> -> vector<8x4xf32>
    %183 = tpu.concatenate %35, %56, %77, %98, %119, %140, %161, %182 in 1 : vector<8x4xf32>, vector<8x4xf32>, vector<8x4xf32>, vector<8x4xf32>, vector<8x4xf32>, vector<8x4xf32>, vector<8x4xf32>, vector<8x4xf32> -> vector<8x32xf32>
    %184 = arith.truncf %183 : vector<8x32xf32> to vector<8x32xbf16>
    %c0_48 = arith.constant 0 : index
    %c0_49 = arith.constant 0 : index
    %c0_50 = arith.constant 0 : index
    %185 = vector.load %arg5[%c0_48, %c0_49, %c0_50] : memref<1x32x32xbf16, #tpu.memory_space<vmem>>, vector<1x32x32xbf16>
    %186 = vector.shape_cast %185 : vector<1x32x32xbf16> to vector<32x32xbf16>
    %cst_51 = arith.constant dense<0.000000e+00> : vector<8x32xf32>
    %187 = tpu.matmul %184, %186, %cst_51 {dimension_numbers = #tpu.dot_dimension_numbers<[1], [0], [0], [1], [0, 0, 1, 1], [], []>} : vector<8x32xbf16>, vector<32x32xbf16>, vector<8x32xf32> -> vector<8x32xf32>
    %c0_52 = arith.constant 0 : index
    %c0_53 = arith.constant 0 : index
    %c0_54 = arith.constant 0 : index
    %188 = vector.load %arg6[%c0_52, %c0_53, %c0_54] : memref<1x1x32xf32, #tpu.memory_space<vmem>>, vector<1x1x32xf32>
    %189 = vector.shape_cast %188 : vector<1x1x32xf32> to vector<1x32xf32>
    %190 = vector.broadcast %189 : vector<1x32xf32> to vector<8x32xf32>
    %191 = arith.addf %187, %190 : vector<8x32xf32>
    %192 = arith.addf %3, %191 : vector<8x32xf32>
    %c0_55 = arith.constant 0 : index
    %c0_56 = arith.constant 0 : index
    %c0_57 = arith.constant 0 : index
    %193 = vector.load %arg7[%c0_55, %c0_56, %c0_57] : memref<1x1x32xf32, #tpu.memory_space<vmem>>, vector<1x1x32xf32>
    %194 = vector.shape_cast %193 : vector<1x1x32xf32> to vector<1x32xf32>
    %c0_58 = arith.constant 0 : index
    %c0_59 = arith.constant 0 : index
    %c0_60 = arith.constant 0 : index
    %195 = vector.load %arg8[%c0_58, %c0_59, %c0_60] : memref<1x1x32xf32, #tpu.memory_space<vmem>>, vector<1x1x32xf32>
    %196 = vector.shape_cast %195 : vector<1x1x32xf32> to vector<1x32xf32>
    %cst_61 = arith.constant dense<0.000000e+00> : vector<8xf32>
    %197 = vector.multi_reduction <add>, %192, %cst_61 [1] : vector<8x32xf32> to vector<8xf32>
    %198 = vector.shape_cast %197 : vector<8xf32> to vector<8x1xf32>
    %cst_62 = arith.constant 3.200000e+01 : f32
    %199 = vector.broadcast %cst_62 : f32 to vector<8x1xf32>
    %200 = arith.divf %198, %199 : vector<8x1xf32>
    %201 = vector.broadcast %200 : vector<8x1xf32> to vector<8x32xf32>
    %202 = arith.subf %192, %201 : vector<8x32xf32>
    %203 = arith.mulf %202, %202 : vector<8x32xf32>
    %cst_63 = arith.constant dense<0.000000e+00> : vector<8xf32>
    %204 = vector.multi_reduction <add>, %203, %cst_63 [1] : vector<8x32xf32> to vector<8xf32>
    %205 = vector.shape_cast %204 : vector<8xf32> to vector<8x1xf32>
    %cst_64 = arith.constant 3.200000e+01 : f32
    %206 = vector.broadcast %cst_64 : f32 to vector<8x1xf32>
    %207 = arith.divf %205, %206 : vector<8x1xf32>
    %208 = vector.broadcast %200 : vector<8x1xf32> to vector<8x32xf32>
    %209 = arith.subf %192, %208 : vector<8x32xf32>
    %cst_65 = arith.constant 9.99999974E-6 : f32
    %210 = vector.broadcast %cst_65 : f32 to vector<8x1xf32>
    %211 = arith.addf %207, %210 : vector<8x1xf32>
    %212 = math.rsqrt %211 : vector<8x1xf32>
    %213 = vector.broadcast %212 : vector<8x1xf32> to vector<8x32xf32>
    %214 = arith.mulf %209, %213 : vector<8x32xf32>
    %215 = vector.broadcast %194 : vector<1x32xf32> to vector<8x32xf32>
    %216 = arith.mulf %214, %215 : vector<8x32xf32>
    %217 = vector.broadcast %196 : vector<1x32xf32> to vector<8x32xf32>
    %218 = arith.addf %216, %217 : vector<8x32xf32>
    %219 = arith.truncf %218 : vector<8x32xf32> to vector<8x32xbf16>
    %c0_66 = arith.constant 0 : index
    %c0_67 = arith.constant 0 : index
    %c0_68 = arith.constant 0 : index
    %220 = vector.load %arg9[%c0_66, %c0_67, %c0_68] : memref<1x32x128xbf16, #tpu.memory_space<vmem>>, vector<1x32x128xbf16>
    %221 = vector.shape_cast %220 : vector<1x32x128xbf16> to vector<32x128xbf16>
    %cst_69 = arith.constant dense<0.000000e+00> : vector<8x128xf32>
    %222 = tpu.matmul %219, %221, %cst_69 {dimension_numbers = #tpu.dot_dimension_numbers<[1], [0], [0], [1], [0, 0, 1, 1], [], []>} : vector<8x32xbf16>, vector<32x128xbf16>, vector<8x128xf32> -> vector<8x128xf32>
    %c0_70 = arith.constant 0 : index
    %c0_71 = arith.constant 0 : index
    %c0_72 = arith.constant 0 : index
    %223 = vector.load %arg10[%c0_70, %c0_71, %c0_72] : memref<1x1x128xf32, #tpu.memory_space<vmem>>, vector<1x1x128xf32>
    %224 = vector.shape_cast %223 : vector<1x1x128xf32> to vector<1x128xf32>
    %225 = vector.broadcast %224 : vector<1x128xf32> to vector<8x128xf32>
    %226 = arith.addf %222, %225 : vector<8x128xf32>
    %cst_73 = arith.constant 5.000000e-01 : f32
    %227 = vector.broadcast %cst_73 : f32 to vector<8x128xf32>
    %228 = arith.mulf %227, %226 : vector<8x128xf32>
    %cst_74 = arith.constant 0.707106769 : f32
    %229 = vector.broadcast %cst_74 : f32 to vector<8x128xf32>
    %230 = arith.mulf %226, %229 : vector<8x128xf32>
    %cst_75 = arith.constant 0.000000e+00 : f32
    %231 = vector.broadcast %cst_75 : f32 to vector<8x128xf32>
    %232 = arith.cmpf olt, %230, %231 : vector<8x128xf32>
    %cst_76 = arith.constant -1.000000e+00 : f32
    %cst_77 = arith.constant 1.000000e+00 : f32
    %233 = vector.broadcast %cst_76 : f32 to vector<8x128xf32>
    %234 = vector.broadcast %cst_77 : f32 to vector<8x128xf32>
    %235 = arith.select %232, %233, %234 : vector<8x128xi1>, vector<8x128xf32>
    %236 = math.absf %230 : vector<8x128xf32>
    %cst_78 = arith.constant 0.327591091 : f32
    %237 = vector.broadcast %cst_78 : f32 to vector<8x128xf32>
    %238 = arith.mulf %237, %236 : vector<8x128xf32>
    %cst_79 = arith.constant 1.000000e+00 : f32
    %239 = vector.broadcast %cst_79 : f32 to vector<8x128xf32>
    %240 = arith.addf %239, %238 : vector<8x128xf32>
    %cst_80 = arith.constant 1.000000e+00 : f32
    %241 = vector.broadcast %cst_80 : f32 to vector<8x128xf32>
    %242 = arith.divf %241, %240 : vector<8x128xf32>
    %cst_81 = arith.constant 1.06140542 : f32
    %243 = vector.broadcast %cst_81 : f32 to vector<8x128xf32>
    %244 = arith.mulf %242, %243 : vector<8x128xf32>
    %cst_82 = arith.constant -1.45315206 : f32
    %245 = vector.broadcast %cst_82 : f32 to vector<8x128xf32>
    %246 = arith.addf %245, %244 : vector<8x128xf32>
    %247 = arith.mulf %242, %246 : vector<8x128xf32>
    %cst_83 = arith.constant 1.42141378 : f32
    %248 = vector.broadcast %cst_83 : f32 to vector<8x128xf32>
    %249 = arith.addf %248, %247 : vector<8x128xf32>
    %250 = arith.mulf %242, %249 : vector<8x128xf32>
    %cst_84 = arith.constant -0.284496725 : f32
    %251 = vector.broadcast %cst_84 : f32 to vector<8x128xf32>
    %252 = arith.addf %251, %250 : vector<8x128xf32>
    %253 = arith.mulf %242, %252 : vector<8x128xf32>
    %cst_85 = arith.constant 0.254829586 : f32
    %254 = vector.broadcast %cst_85 : f32 to vector<8x128xf32>
    %255 = arith.addf %254, %253 : vector<8x128xf32>
    %256 = arith.mulf %242, %255 : vector<8x128xf32>
    %cst_86 = arith.constant 0.000000e+00 : f32
    %257 = vector.broadcast %cst_86 : f32 to vector<8x128xf32>
    %258 = arith.subf %257, %236 : vector<8x128xf32>
    %259 = arith.mulf %258, %236 : vector<8x128xf32>
    %260 = math.exp %259 : vector<8x128xf32>
    %261 = arith.mulf %256, %260 : vector<8x128xf32>
    %cst_87 = arith.constant 1.000000e+00 : f32
    %262 = vector.broadcast %cst_87 : f32 to vector<8x128xf32>
    %263 = arith.subf %262, %261 : vector<8x128xf32>
    %264 = arith.mulf %235, %263 : vector<8x128xf32>
    %cst_88 = arith.constant 1.000000e+00 : f32
    %265 = vector.broadcast %cst_88 : f32 to vector<8x128xf32>
    %266 = arith.addf %265, %264 : vector<8x128xf32>
    %267 = arith.mulf %228, %266 : vector<8x128xf32>
    %268 = arith.truncf %267 : vector<8x128xf32> to vector<8x128xbf16>
    %c0_89 = arith.constant 0 : index
    %c0_90 = arith.constant 0 : index
    %c0_91 = arith.constant 0 : index
    %269 = vector.load %arg11[%c0_89, %c0_90, %c0_91] : memref<1x128x32xbf16, #tpu.memory_space<vmem>>, vector<1x128x32xbf16>
    %270 = vector.shape_cast %269 : vector<1x128x32xbf16> to vector<128x32xbf16>
    %cst_92 = arith.constant dense<0.000000e+00> : vector<8x32xf32>
    %271 = tpu.matmul %268, %270, %cst_92 {dimension_numbers = #tpu.dot_dimension_numbers<[1], [0], [0], [1], [0, 0, 1, 1], [], []>} : vector<8x128xbf16>, vector<128x32xbf16>, vector<8x32xf32> -> vector<8x32xf32>
    %c0_93 = arith.constant 0 : index
    %c0_94 = arith.constant 0 : index
    %c0_95 = arith.constant 0 : index
    %272 = vector.load %arg12[%c0_93, %c0_94, %c0_95] : memref<1x1x32xf32, #tpu.memory_space<vmem>>, vector<1x1x32xf32>
    %273 = vector.shape_cast %272 : vector<1x1x32xf32> to vector<1x32xf32>
    %274 = vector.broadcast %273 : vector<1x32xf32> to vector<8x32xf32>
    %275 = arith.addf %271, %274 : vector<8x32xf32>
    %cst_96 = arith.constant 5.000000e-01 : f32
    %276 = vector.broadcast %cst_96 : f32 to vector<8x32xf32>
    %277 = arith.mulf %276, %275 : vector<8x32xf32>
    %cst_97 = arith.constant 0.707106769 : f32
    %278 = vector.broadcast %cst_97 : f32 to vector<8x32xf32>
    %279 = arith.mulf %275, %278 : vector<8x32xf32>
    %cst_98 = arith.constant 0.000000e+00 : f32
    %280 = vector.broadcast %cst_98 : f32 to vector<8x32xf32>
    %281 = arith.cmpf olt, %279, %280 : vector<8x32xf32>
    %cst_99 = arith.constant -1.000000e+00 : f32
    %cst_100 = arith.constant 1.000000e+00 : f32
    %282 = vector.broadcast %cst_99 : f32 to vector<8x32xf32>
    %283 = vector.broadcast %cst_100 : f32 to vector<8x32xf32>
    %284 = arith.select %281, %282, %283 : vector<8x32xi1>, vector<8x32xf32>
    %285 = math.absf %279 : vector<8x32xf32>
    %cst_101 = arith.constant 0.327591091 : f32
    %286 = vector.broadcast %cst_101 : f32 to vector<8x32xf32>
    %287 = arith.mulf %286, %285 : vector<8x32xf32>
    %cst_102 = arith.constant 1.000000e+00 : f32
    %288 = vector.broadcast %cst_102 : f32 to vector<8x32xf32>
    %289 = arith.addf %288, %287 : vector<8x32xf32>
    %cst_103 = arith.constant 1.000000e+00 : f32
    %290 = vector.broadcast %cst_103 : f32 to vector<8x32xf32>
    %291 = arith.divf %290, %289 : vector<8x32xf32>
    %cst_104 = arith.constant 1.06140542 : f32
    %292 = vector.broadcast %cst_104 : f32 to vector<8x32xf32>
    %293 = arith.mulf %291, %292 : vector<8x32xf32>
    %cst_105 = arith.constant -1.45315206 : f32
    %294 = vector.broadcast %cst_105 : f32 to vector<8x32xf32>
    %295 = arith.addf %294, %293 : vector<8x32xf32>
    %296 = arith.mulf %291, %295 : vector<8x32xf32>
    %cst_106 = arith.constant 1.42141378 : f32
    %297 = vector.broadcast %cst_106 : f32 to vector<8x32xf32>
    %298 = arith.addf %297, %296 : vector<8x32xf32>
    %299 = arith.mulf %291, %298 : vector<8x32xf32>
    %cst_107 = arith.constant -0.284496725 : f32
    %300 = vector.broadcast %cst_107 : f32 to vector<8x32xf32>
    %301 = arith.addf %300, %299 : vector<8x32xf32>
    %302 = arith.mulf %291, %301 : vector<8x32xf32>
    %cst_108 = arith.constant 0.254829586 : f32
    %303 = vector.broadcast %cst_108 : f32 to vector<8x32xf32>
    %304 = arith.addf %303, %302 : vector<8x32xf32>
    %305 = arith.mulf %291, %304 : vector<8x32xf32>
    %cst_109 = arith.constant 0.000000e+00 : f32
    %306 = vector.broadcast %cst_109 : f32 to vector<8x32xf32>
    %307 = arith.subf %306, %285 : vector<8x32xf32>
    %308 = arith.mulf %307, %285 : vector<8x32xf32>
    %309 = math.exp %308 : vector<8x32xf32>
    %310 = arith.mulf %305, %309 : vector<8x32xf32>
    %cst_110 = arith.constant 1.000000e+00 : f32
    %311 = vector.broadcast %cst_110 : f32 to vector<8x32xf32>
    %312 = arith.subf %311, %310 : vector<8x32xf32>
    %313 = arith.mulf %284, %312 : vector<8x32xf32>
    %cst_111 = arith.constant 1.000000e+00 : f32
    %314 = vector.broadcast %cst_111 : f32 to vector<8x32xf32>
    %315 = arith.addf %314, %313 : vector<8x32xf32>
    %316 = arith.mulf %277, %315 : vector<8x32xf32>
    %317 = arith.addf %218, %316 : vector<8x32xf32>
    %c0_112 = arith.constant 0 : index
    %c0_113 = arith.constant 0 : index
    %c0_114 = arith.constant 0 : index
    %318 = vector.load %arg13[%c0_112, %c0_113, %c0_114] : memref<1x1x32xf32, #tpu.memory_space<vmem>>, vector<1x1x32xf32>
    %319 = vector.shape_cast %318 : vector<1x1x32xf32> to vector<1x32xf32>
    %c0_115 = arith.constant 0 : index
    %c0_116 = arith.constant 0 : index
    %c0_117 = arith.constant 0 : index
    %320 = vector.load %arg14[%c0_115, %c0_116, %c0_117] : memref<1x1x32xf32, #tpu.memory_space<vmem>>, vector<1x1x32xf32>
    %321 = vector.shape_cast %320 : vector<1x1x32xf32> to vector<1x32xf32>
    %cst_118 = arith.constant dense<0.000000e+00> : vector<8xf32>
    %322 = vector.multi_reduction <add>, %317, %cst_118 [1] : vector<8x32xf32> to vector<8xf32>
    %323 = vector.shape_cast %322 : vector<8xf32> to vector<8x1xf32>
    %cst_119 = arith.constant 3.200000e+01 : f32
    %324 = vector.broadcast %cst_119 : f32 to vector<8x1xf32>
    %325 = arith.divf %323, %324 : vector<8x1xf32>
    %326 = vector.broadcast %325 : vector<8x1xf32> to vector<8x32xf32>
    %327 = arith.subf %317, %326 : vector<8x32xf32>
    %328 = arith.mulf %327, %327 : vector<8x32xf32>
    %cst_120 = arith.constant dense<0.000000e+00> : vector<8xf32>
    %329 = vector.multi_reduction <add>, %328, %cst_120 [1] : vector<8x32xf32> to vector<8xf32>
    %330 = vector.shape_cast %329 : vector<8xf32> to vector<8x1xf32>
    %cst_121 = arith.constant 3.200000e+01 : f32
    %331 = vector.broadcast %cst_121 : f32 to vector<8x1xf32>
    %332 = arith.divf %330, %331 : vector<8x1xf32>
    %333 = vector.broadcast %325 : vector<8x1xf32> to vector<8x32xf32>
    %334 = arith.subf %317, %333 : vector<8x32xf32>
    %cst_122 = arith.constant 9.99999974E-6 : f32
    %335 = vector.broadcast %cst_122 : f32 to vector<8x1xf32>
    %336 = arith.addf %332, %335 : vector<8x1xf32>
    %337 = math.rsqrt %336 : vector<8x1xf32>
    %338 = vector.broadcast %337 : vector<8x1xf32> to vector<8x32xf32>
    %339 = arith.mulf %334, %338 : vector<8x32xf32>
    %340 = vector.broadcast %319 : vector<1x32xf32> to vector<8x32xf32>
    %341 = arith.mulf %339, %340 : vector<8x32xf32>
    %342 = vector.broadcast %321 : vector<1x32xf32> to vector<8x32xf32>
    %343 = arith.addf %341, %342 : vector<8x32xf32>
    %c0_123 = arith.constant 0 : index
    %c0_124 = arith.constant 0 : index
    %344 = vector.load %arg16[%c0_123, %c0_124] : memref<8x32xf32, #tpu.memory_space<vmem>>, vector<8x32xf32>
    tpu.vector_store %arg16[%c0_123, %c0_124], %343 {strides = array<i32>} : memref<8x32xf32, #tpu.memory_space<vmem>>, vector<8x32xf32>,
    %c1_i32 = arith.constant 1 : i32
    %345 = arith.cmpi eq, %arg1, %c1_i32 : i32
    %346 = arith.extui %345 : i1 to i32
    %c0_i32_125 = arith.constant 0 : i32
    %347 = arith.cmpi ne, %346, %c0_i32_125 : i32
    scf.if %347 {
      %c0_126 = arith.constant 0 : index
      %c0_127 = arith.constant 0 : index
      %c0_128 = arith.constant 0 : index
      %348 = vector.load %arg15[%c0_126, %c0_127, %c0_128] : memref<1x8x32xf32, #tpu.memory_space<vmem>>, vector<1x8x32xf32>
      %349 = vector.shape_cast %348 : vector<1x8x32xf32> to vector<8x32xf32>
      %350 = vector.shape_cast %343 : vector<8x32xf32> to vector<1x8x32xf32>
      tpu.vector_store %arg15[%c0_126, %c0_127, %c0_128], %350 {strides = array<i32>} : memref<1x8x32xf32, #tpu.memory_space<vmem>>, vector<1x8x32xf32>,
    } else {
    }
    return
  }
  func.func @transform_0(%arg0: i32, %arg1: i32) -> (i32, i32, i32) {
    %c0_i32 = arith.constant 0 : i32
    %c0_i32_0 = arith.constant 0 : i32
    %c0_i32_1 = arith.constant 0 : i32
    return %arg0, %c0_i32, %c0_i32_0 : i32, i32, i32
  }
  func.func @transform_1(%arg0: i32, %arg1: i32) -> (i32, i32, i32) {
    %c0_i32 = arith.constant 0 : i32
    %c0_i32_0 = arith.constant 0 : i32
    %c0_i32_1 = arith.constant 0 : i32
    return %arg1, %c0_i32, %c0_i32_0 : i32, i32, i32
  }
  func.func @transform_2(%arg0: i32, %arg1: i32) -> (i32, i32, i32) {
    %c0_i32 = arith.constant 0 : i32
    %c0_i32_0 = arith.constant 0 : i32
    %c0_i32_1 = arith.constant 0 : i32
    return %arg1, %c0_i32, %c0_i32_0 : i32, i32, i32
  }
  func.func @transform_3(%arg0: i32, %arg1: i32) -> (i32, i32, i32) {
    %c0_i32 = arith.constant 0 : i32
    %c0_i32_0 = arith.constant 0 : i32
    %c0_i32_1 = arith.constant 0 : i32
    return %arg1, %c0_i32, %c0_i32_0 : i32, i32, i32
  }
  func.func @transform_4(%arg0: i32, %arg1: i32) -> (i32, i32, i32) {
    %c0_i32 = arith.constant 0 : i32
    %c0_i32_0 = arith.constant 0 : i32
    %c0_i32_1 = arith.constant 0 : i32
    return %arg1, %c0_i32, %c0_i32_0 : i32, i32, i32
  }
  func.func @transform_5(%arg0: i32, %arg1: i32) -> (i32, i32, i32) {
    %c0_i32 = arith.constant 0 : i32
    %c0_i32_0 = arith.constant 0 : i32
    %c0_i32_1 = arith.constant 0 : i32
    return %arg1, %c0_i32, %c0_i32_0 : i32, i32, i32
  }
  func.func @transform_6(%arg0: i32, %arg1: i32) -> (i32, i32, i32) {
    %c0_i32 = arith.constant 0 : i32
    %c0_i32_0 = arith.constant 0 : i32
    %c0_i32_1 = arith.constant 0 : i32
    return %arg1, %c0_i32, %c0_i32_0 : i32, i32, i32
  }
  func.func @transform_7(%arg0: i32, %arg1: i32) -> (i32, i32, i32) {
    %c0_i32 = arith.constant 0 : i32
    %c0_i32_0 = arith.constant 0 : i32
    %c0_i32_1 = arith.constant 0 : i32
    return %arg1, %c0_i32, %c0_i32_0 : i32, i32, i32
  }
  func.func @transform_8(%arg0: i32, %arg1: i32) -> (i32, i32, i32) {
    %c0_i32 = arith.constant 0 : i32
    %c0_i32_0 = arith.constant 0 : i32
    %c0_i32_1 = arith.constant 0 : i32
    return %arg1, %c0_i32, %c0_i32_0 : i32, i32, i32
  }
  func.func @transform_9(%arg0: i32, %arg1: i32) -> (i32, i32, i32) {
    %c0_i32 = arith.constant 0 : i32
    %c0_i32_0 = arith.constant 0 : i32
    %c0_i32_1 = arith.constant 0 : i32
    return %arg1, %c0_i32, %c0_i32_0 : i32, i32, i32
  }
  func.func @transform_10(%arg0: i32, %arg1: i32) -> (i32, i32, i32) {
    %c0_i32 = arith.constant 0 : i32
    %c0_i32_0 = arith.constant 0 : i32
    %c0_i32_1 = arith.constant 0 : i32
    return %arg1, %c0_i32, %c0_i32_0 : i32, i32, i32
  }
  func.func @transform_11(%arg0: i32, %arg1: i32) -> (i32, i32, i32) {
    %c0_i32 = arith.constant 0 : i32
    %c0_i32_0 = arith.constant 0 : i32
    %c0_i32_1 = arith.constant 0 : i32
    return %arg1, %c0_i32, %c0_i32_0 : i32, i32, i32
  }
  func.func @transform_12(%arg0: i32, %arg1: i32) -> (i32, i32, i32) {
    %c0_i32 = arith.constant 0 : i32
    %c0_i32_0 = arith.constant 0 : i32
    %c0_i32_1 = arith.constant 0 : i32
    return %arg1, %c0_i32, %c0_i32_0 : i32, i32, i32
  }
  func.func @transform_13(%arg0: i32, %arg1: i32) -> (i32, i32, i32) {
    %c0_i32 = arith.constant 0 : i32
    %c0_i32_0 = arith.constant 0 : i32
    %c0_i32_1 = arith.constant 0 : i32
    return %arg0, %c0_i32, %c0_i32_0 : i32, i32, i32
  }
}

</mosaic_0001>

<bundles_post_ra>
// kernel: bidirectional_transformer.3
= control target key start
LH: loop header
LB: loop body
LE: loop exit
PB: predicated region body
PF: predicated region fallthrough
CT: control target
= control target key end

     0   :  { %v151_v1 = vmov 0.0   ;;  %vm152_vm0 = vmmov 0   ;;  %s203_s0 = inlined_call_operand.vmem [shape: f32[16,32], index: 0, kind: input, shape index: {}]   ;;  %s204_s1 = inlined_call_operand.vmem [shape: bf16[32,128], index: 1, kind: input, shape index: {}]   ;;  %s205_s2 = inlined_call_operand.vmem [shape: f32[1,128], index: 2, kind: input, shape index: {}]   ;;  %s206_s3 = inlined_call_operand.hbm [shape: f32[16,128], index: 3, kind: output, shape index: {}]  }
   0x1   :  { %v125_v0 = vld [vmem:[%s204_s1] sm:$0xff]   ;;  %112 = vmatprep.subr.bf16.mxu0 %v151_v1  ;;  %v126_v2 = vld [vmem:[%s204_s1 + $0x8] sm:$0xff]   ;;  %116 = vmatprep.mubr.msk.bf16.mxu0 %vm152_vm0, %v151_v1 }
   0x2   :  { %113 = vmatpush3.bf16.msra.mxu0 %v125_v0  ;;  %v16_v3 = vld [vmem:[%s203_s0] sm:$0xff]  ;;  %v17_v4 = vld [vmem:[%s203_s0 + $0x8] sm:$0xff] }
   0x3   :  { %114 = vmatprep.subr.bf16.mxu0 %v151_v1 }
   0x4   :  { %8 = vsyncpa [#allocation3], 0  ;;  %v18_v5 = vpack.c.bf16 %v17_v4, %v16_v3  ;;  %vm42_vm1 = vcmask 261120   ;;  %v105_v6 = vld [vmem:[%s205_s2] ss:$0 sm:$0xff]  ;;  %s153_s1 = smov [#allocation2]  }
   0x5   :  { %s94_s22 = sshll.u32 %s153_s1, 4  ;;  %s95_s22 = int_to_ptr.vmem [resolvable:$true] %s94_s22 }
   0x6   :  { %115 = vmatpush3.bf16.msra.mxu0 %v126_v2  ;;  %s127_s0 = scalar_lea.vmem %s95_s22, 256  ;;  %p132_p1 = scmp.lt.s32.totalorder %s95_s22, %s95_s22 }
   0x7   :  { %p128_p0 = scmp.ne.s32.totalorder %s95_s22, %s127_s0  ;;  %p133_p2 = scmp.lt.s32.totalorder %s127_s0, %s127_s0 }
   0x9   :  { %117 = vmatmul.mubr.msk.bf16.vlgmr.msra.gmra.mrb[0].mxu0 %vm42_vm1, %v18_v5  ;;  %p134_p3 = por %p133_p2, %p132_p1 }
   0xb   :  { %p135_p4 = pnand %p134_p3, %p128_p0 }
  0xdc   :  { %v80_v7 = vpop.f32.mrb[0].mxu0 }
  0xdd   :  { %v81_v8 = vadd.f32 %v105_v6, %v80_v7  ;;  %v118_v9 = vpop.f32.mrb[1].mxu0 }
  0xde   :  { %v83_v10 = vpop.f32.mrb[2].mxu0 }
  0xdf   :  { %87 = vst [vmem:[#allocation2] sm:$0xff] %v81_v8  ;;  %v84_v11 = vadd.f32 %v105_v6, %v83_v10  ;;  %v119_v12 = vpop.f32.mrb[3].mxu0 }
  0xe1   :  { %88 = vst [vmem:[#allocation2 + $0x8] sm:$0xff] %v84_v11 }
  0xe2   :  { %138 = shalt.err (!%p135_p4)
}
  0xe3   :  { %s139_s24 = scalar_lea.hbm %s206_s3, 256 }
  0xe4   :  { %p140_p5 = scmp.ne.s32.totalorder %s206_s3, %s139_s24  ;;  %p143_p6 = scmp.lt.u32.totalorder %s139_s24, %s206_s3 }
  0xe6   :  { %p145_p7 = pnand %p143_p6, %p140_p5 }
  0xe8   :  { %148 = shalt.err (!%p145_p7)
}
  0xe9   :  { %s154_s29 = smov 128   ;;  %s155_s30 = smov 8  }
  0xea   :  { %100 = dma.vmem_to_hbm [thread:$0]  %s95_s22, 256, %s206_s3, [#allocation3], %s154_s29, %s154_s29, %s155_s30  }
  0xeb   :  { %149 = dma.done.wait [#allocation3], 256  }
  0xec   :  { %150 = vsyncadd [#allocation3], 4294967040 }
  0xed   :  { %104 = vsyncpa [#allocation3], 1 }

// kernel: bidirectional_transformer.2
= control target key start
LH: loop header
LB: loop body
LE: loop exit
PB: predicated region body
PF: predicated region fallthrough
CT: control target
= control target key end

     0   :  { %s2856_s25 = smov 0   ;;  %s2858_s26 = smov 0   ;;  %s3236_s0 = inlined_call_operand.vmem [shape: f32[2,8,32], index: 0, kind: input, shape index: {}]   ;;  %s3237_s1 = inlined_call_operand.vmem [shape: bf16[2,32,96], index: 1, kind: input, shape index: {}]   ;;  %s3238_s2 = inlined_call_operand.vmem [shape: f32[2,1,96], index: 2, kind: input, shape index: {}]   ;;  %s3239_s3 = inlined_call_operand.vmem [shape: bf16[2,32,32], index: 3, kind: input, shape index: {}]   ;;  %s3240_s4 = inlined_call_operand.vmem [shape: f32[2,1,32], index: 4, kind: input, shape index: {}]   ;;  %s3241_s5 = inlined_call_operand.vmem [shape: f32[2,1,32], index: 5, kind: input, shape index: {}]   ;;  %s3242_s6 = inlined_call_operand.vmem [shape: f32[2,1,32], index: 6, kind: input, shape index: {}]   ;;  %s3243_s7 = inlined_call_operand.vmem [shape: bf16[2,32,128], index: 7, kind: input, shape index: {}]   ;;  %s3244_s8 = inlined_call_operand.vmem [shape: f32[2,1,128], index: 8, kind: input, shape index: {}]   ;;  %s3245_s9 = inlined_call_operand.vmem [shape: bf16[2,128,32], index: 9, kind: input, shape index: {}]   ;;  %s3246_s10 = inlined_call_operand.vmem [shape: f32[2,1,32], index: 10, kind: input, shape index: {}]   ;;  %s3247_s11 = inlined_call_operand.vmem [shape: f32[2,1,32], index: 11, kind: input, shape index: {}]   ;;  %s3248_s12 = inlined_call_operand.vmem [shape: f32[2,1,32], index: 12, kind: input, shape index: {}]   ;;  %s3249_s13 = inlined_call_operand.vmem [shape: f32[2,8,32], index: 13, kind: output, shape index: {}]  }
   0x1   :  { %3254 = sst [smem:[#allocation9_spill]] %s3236_s0  ;;  %s2860_s27 = smov 0  }
   0x2   :  { %3255 = sst [smem:[#allocation10_spill]] %s3237_s1  ;;  %s2862_s28 = smov 0  }
   0x3   :  { %3256 = sst [smem:[#allocation11_spill]] %s3239_s3  ;;  %s2864_s29 = smov 0  }
   0x4   :  { %3257 = sst [smem:[#allocation12_spill]] %s3243_s7 }
   0x5   :  { %3258 = sst [smem:[#allocation13_spill]] %s3244_s8 }
   0x6   :  { %3259 = sst [smem:[#allocation14_spill]] %s3248_s12 }
   0x7   :  { %3260 = sst [smem:[#allocation15_spill]] %s3249_s13 }
   0x8 LB: > { %3261 = sst [smem:[#allocation3_spill]] %s2735_s25  ;;  %s32_s30 = sadd.s32 1, %s2743_s27  ;;  %s2751_s29 = sphi %s2864_s29, %s23_s29   ;;  %s2747_s28 = sphi %s2862_s28, %s3287_s28   ;;  %s2743_s27 = sphi %s2860_s27, %s3286_s27   ;;  %s2739_s26 = sphi %s2858_s26, %s3285_s26   ;;  %s2735_s25 = sphi %s2856_s25, %s3284_s25  }
   0x9   : > { %3262 = sst [smem:[#allocation4_spill]] %s2743_s27  ;;  %s35_s14 = sadd.s32 1, %s2747_s28 }
   0xa   : > { %3263 = sst [smem:[#allocation5_spill]] %s2747_s28  ;;  %p33_p0 = scmp.ge.s32.totalorder %s32_s30, 2 }
   0xb   : > { %3264 = sst [smem:[#allocation6_spill]] %s2751_s29  ;;  %p2331_p1 = scmp.ge.s32.totalorder %s2751_s29, 1 }
   0xc   : > { %p502_p2 = scmp.lt.s32.totalorder %s2751_s29, 5  ;;  %s3289_s30 = smov (%p33_p0, %s32_s30), 0 }
   0xd   : > { %3265 = sst [smem:[#allocation7_spill]] %s3289_s30  ;;  %s3291_s14 = smov (!%p33_p0, %s35_s14), %s2747_s28 }
   0xe   : > { %p503_p3 = pnand %p2331_p1, %p502_p2  ;;  %p37_p4 = scmp.ge.s32.totalorder %s3291_s14, 2 }
   0xf   : > { %p588_p5 = scmp.lt.s32.totalorder (!%p503_p3), %s2739_s26, 1  ;;  %p592_p6 = scmp.lt.s32.totalorder (!%p503_p3), %s2735_s25, 1 }
  0x10   : > { %s3293_s14 = smov (%p37_p4, %s3291_s14), 0  ;;  %506 = sbr.rel (%p503_p3) target bundleno = 2815 (0xaff), region = 72 }
  0x11   : > { %3266 = sst [smem:[#allocation8_spill]] %s3293_s14  ;;  %s3267_s0 = sld [smem:[#allocation9_spill]] (!%p503_p3) }
  0x12   : > { %s3268_s1 = sld [smem:[#allocation10_spill]] (!%p503_p3)  ;;  %s3269_s3 = sld [smem:[#allocation11_spill]] (!%p503_p3) }
  0x13   : > { %s3270_s7 = sld [smem:[#allocation12_spill]] (!%p503_p3)  ;;  %s3272_s22 = sld [smem:[#allocation14_spill]] (!%p503_p3) }
  0x14   : > { %s3273_s30 = sld [smem:[#allocation15_spill]] (!%p503_p3) }
  0x17   : > { %s3295_s26 = smov (!%p588_p5, %s2739_s26), 1 }
  0x18   : > { %s2890_s15 = scalar_select %p592_p6, %s2735_s25, 1 }
  0x19   : > { %s2332_s16 = sshll.u32 %s3295_s26, 3  ;;  %s3274_s25 = sld [smem:[#allocation3_spill]] }
  0x1a   : > { %s591_s19 = scalar_lea.vmem %s3267_s0, %s2332_s16  ;;  %s2387_s20 = sshll.u32 %s2890_s15, 4 }
  0x1b   : > { %s596_s23 = scalar_lea.vmem %s3268_s1, %s2387_s20  ;;  %s2906_s29 = scalar_lea.vmem %s3269_s3, %s2387_s20 }
  0x1c   : > { %s2923_s24 = scalar_lea.vmem %s3270_s7, %s2387_s20  ;;  %s2390_s3 = sshll.u32 %s2890_s15, 6 }
  0x1d   : > { %s629_s13 = scalar_lea.vmem %s3246_s10, %s2890_s15  ;;  %s2937_s0 = scalar_lea.vmem %s3245_s9, %s2390_s3 }
  0x1e   : > { %s632_s1 = scalar_lea.vmem %s3247_s11, %s2890_s15  ;;  %s635_s7 = scalar_lea.vmem %s3272_s22, %s2890_s15 }
  0x1f   : > { %s2950_s8 = scalar_lea.vmem %s3273_s30, %s2332_s16  ;;  %p2342_p7 = scmp.ne.s32.totalorder %s3274_s25, 0 }
  0x20   : > { %v645_v0 = vld [vmem:[%s591_s19] sm:$0xff] (!%p2342_p7)  ;;  %vm646_vm0 = vcmask (!%p2342_p7), 261120  }
  0x21   : > { %644 = sbr.rel (%p2342_p7) target bundleno = 40 (0x28), region = 76  ;;  %647 = vst.msk [vmem:[#allocation2] sm:$0xff] (!%p2342_p7), %vm646_vm0, %v645_v0 }
  0x28 PF: > { %v2655_v1 = vld [vmem:[%s596_s23] sm:$0xff]   ;;  %v2753_v2 = vmov 0.0   ;;  %v2656_v3 = vld [vmem:[%s596_s23 + $0x8] sm:$0xff]   ;;  %vm2754_vm1 = vmmov 0   ;;  %vm673_vm2 = vcmask 261120   ;;  %s3275_s16 = scalar_lea.vmem %s3238_s2, %s2890_s15  ;;  %vm721_vm3 = vcmask 31744  }
  0x29   : > { %2441 = vmatprep.subr.bf16.mxu0 %v2753_v2  ;;  %2461 = vmatprep.subr.bf16.mxu1 %v2753_v2  ;;  %v2957_v4 = vld [vmem:[#allocation2] sm:$0xff]  ;;  %s2755_s19 = smov 92   ;;  %s2756_s23 = smov 96   ;;  %vm769_vm4 = vcmask 64512   ;;  %vm803_vm5 = vcmask 1043456   ;;  %vm1766_vm6 = vcmask 97280  }
  0x2a   : > { %2442 = vmatpush3.bf16.msra.mxu0 %v2655_v1  ;;  %2445 = vmatprep.mubr.msk.bf16.mxu0 %vm2754_vm1, %v2753_v2  ;;  %v649_v5 = vpack.c.bf16 %v2957_v4, %v2957_v4  ;;  %v2343_v6 = vld [vmem:[%s3275_s16] ss:$0 sm:$0xff]  ;;  %s2757_s22 = smov 120   ;;  %s2758_s26 = smov 124   ;;  %vm1768_vm7 = vcmask 130048   ;;  %vm1770_vm8 = vcmask 162816  }
  0x2b   : > { %2443 = vmatprep.subr.bf16.mxu0 %v2753_v2  ;;  %2463 = vmatprep.mubr.msk.bf16.mxu1 %vm2754_vm1, %v2753_v2  ;;  %s2759_s17 = smov 116   ;;  %s2760_s18 = smov 88   ;;  %vm1772_vm9 = vcmask 195584   ;;  %vm1774_vm10 = vcmask 228352  }
  0x2c   : > { %s2761_s12 = smov 112   ;;  %s2762_s21 = smov 84  }
  0x2d   : > { %s2763_s20 = smov 108   ;;  %s2764_s14 = smov 80  }
  0x2e   : > { %2444 = vmatpush3.bf16.msra.mxu0 %v2656_v3  ;;  %s2765_s27 = smov 104   ;;  %s2766_s28 = smov 76  }
  0x2f   : > { %2449 = vmatprep.subr.bf16.mxu0 %v2753_v2  ;;  %s2767_s25 = smov 100   ;;  %s2768_s3 = smov 72  }
  0x30   : > { %s2769_s30 = smov 68   ;;  %s2770_s16 = smov 60  }
  0x31   : > { %2446 = vmatmul.mubr.msk.bf16.vlgmr.msra.gmra.mrb[0].mxu0 %vm673_vm2, %v649_v5 }
  0x32   : > { %2451 = vmatprep.mubr.msk.bf16.mxu0 %vm2754_vm1, %v2753_v2 }
 0x104   : > { %v711_v7 = vpop.f32.mrb[0].mxu0 }
 0x105   : > { %v712_v8 = vadd.f32 %v2343_v6, %v711_v7  ;;  %v2447_v9 = vpop.f32.mrb[1].mxu0 }
 0x106   : > { %v714_v10 = vpop.f32.mrb[2].mxu0 }
 0x107   : > { %v2973_v11 = vpack.c.bf16 %v712_v8, %v712_v8  ;;  %v2448_v12 = vpop.f32.mrb[3].mxu0 }
 0x109   : > { %847 = vrot.lane.b32.xlu1 %v2973_v11, %s2755_s19  ;;  %719 = vrot.lane.b32.xlu0 %v2973_v11, %s2756_s23  ;;  %v726_v13 = vsel %vm721_vm3, %v2973_v11, 0  ;;  %s2771_s19 = smov 56   ;;  %s2772_s23 = smov 64  }
 0x10a   : > { %2450 = vmatpush3.bf16.xpose.msra.mxu0 %v726_v13 }
 0x10b   : > { %2455 = vmatprep.subr.bf16.mxu0 %v2753_v2 }
 0x10d   : > { %976 = vrot.lane.b32.xlu1 %v2973_v11, %s2757_s22  ;;  %849 = vrot.lane.b32.xlu0 %v2973_v11, %s2758_s26  ;;  %s2773_s22 = smov 52   ;;  %s2774_s26 = smov 48  }
 0x111   : > { %1103 = vrot.lane.b32.xlu1 %v2973_v11, %s2759_s17  ;;  %974 = vrot.lane.b32.xlu0 %v2973_v11, %s2760_s18  ;;  %s2775_s17 = smov 44   ;;  %s2776_s18 = smov 40  }
 0x115   : > { %1230 = vrot.lane.b32.xlu1 %v2973_v11, %s2761_s12  ;;  %1101 = vrot.lane.b32.xlu0 %v2973_v11, %s2762_s21  ;;  %s2777_s12 = smov 36   ;;  %s2778_s21 = smov 4  }
 0x119   : > { %1357 = vrot.lane.b32.xlu1 %v2973_v11, %s2763_s20  ;;  %1228 = vrot.lane.b32.xlu0 %v2973_v11, %s2764_s14  ;;  %s2779_s20 = smov 8   ;;  %s2780_s14 = smov 12  }
 0x11d   : > { %1484 = vrot.lane.b32.xlu1 %v2973_v11, %s2765_s27  ;;  %1355 = vrot.lane.b32.xlu0 %v2973_v11, %s2766_s28  ;;  %s2781_s27 = smov 16   ;;  %s2782_s28 = smov 20  }
 0x121   : > { %1611 = vrot.lane.b32.xlu1 %v2973_v11, %s2767_s25  ;;  %1482 = vrot.lane.b32.xlu0 %v2973_v11, %s2768_s3  ;;  %s2783_s25 = smov 24   ;;  %s2784_s3 = smov 28  }
 0x125   : > { %1609 = vrot.lane.b32.xlu0 %v2973_v11, %s2769_s30 }
 0x17b   : > { %v720_v14 = vpop.permute.xlu0 %719  ;;  %v848_v15 = vpop.permute.xlu1 %847 }
 0x17c   : > { %2452 = vmatmul.mubr.msk.bf16.vlgmr.msra.gmra.mrb[4].mxu0 %vm721_vm3, %v720_v14 }
 0x17d   : > { %2457 = vmatprep.mubr.msk.bf16.mxu0 %vm2754_vm1, %v2753_v2 }
 0x17f   : > { %v850_v16 = vpop.permute.xlu0 %849  ;;  %v977_v18 = vpop.permute.xlu1 %976 }
 0x180   : > { %v855_v17 = vsel %vm721_vm3, %v850_v16, 0  ;;  %v982_v19 = vsel %vm721_vm3, %v977_v18, 0 }
 0x181   : > { %2462 = vmatpush3.bf16.xpose.msra.mxu1 %v855_v17 }
 0x182   : > { %2473 = vmatprep.subr.bf16.mxu1 %v2753_v2 }
 0x183   : > { %v1104_v20 = vpop.permute.xlu1 %1103  ;;  %v975_v21 = vpop.permute.xlu0 %974 }
 0x184   : > { %v1109_v22 = vsel %vm721_vm3, %v1104_v20, 0 }
 0x187   : > { %v1231_v23 = vpop.permute.xlu1 %1230  ;;  %v1102_v24 = vpop.permute.xlu0 %1101 }
 0x188   : > { %2464 = vmatmul.mubr.msk.bf16.vlgmr.msra.gmra.mrb[0].mxu1 %vm721_vm3, %v848_v15  ;;  %v1236_v25 = vsel %vm721_vm3, %v1231_v23, 0 }
 0x189   : > { %2474 = vmatpush3.bf16.xpose.msra.mxu1 %v982_v19  ;;  %2475 = vmatprep.mubr.msk.bf16.mxu1 %vm2754_vm1, %v2753_v2 }
 0x18a   : > { %2485 = vmatprep.subr.bf16.mxu1 %v2753_v2 }
 0x18b   : > { %v1358_v26 = vpop.permute.xlu1 %1357  ;;  %v1229_v27 = vpop.permute.xlu0 %1228 }
 0x18c   : > { %v1363_v28 = vsel %vm721_vm3, %v1358_v26, 0 }
 0x18f   : > { %v1485_v29 = vpop.permute.xlu1 %1484  ;;  %v1356_v30 = vpop.permute.xlu0 %1355 }
 0x190   : > { %2476 = vmatmul.mubr.msk.bf16.vlgmr.msra.gmra.mrb[4].mxu1 %vm721_vm3, %v975_v21  ;;  %v1490_v31 = vsel %vm721_vm3, %v1485_v29, 0 }
 0x191   : > { %2486 = vmatpush3.bf16.xpose.msra.mxu1 %v1109_v22  ;;  %2487 = vmatprep.mubr.msk.bf16.mxu1 %vm2754_vm1, %v2753_v2 }
 0x192   : > { %2497 = vmatprep.subr.bf16.mxu1 %v2753_v2 }
 0x193   : > { %v1612_v32 = vpop.permute.xlu1 %1611  ;;  %v1483_v33 = vpop.permute.xlu0 %1482 }
 0x194   : > { %v1617_v34 = vsel %vm721_vm3, %v1612_v32, 0 }
 0x197   : > { %v1610_v35 = vpop.permute.xlu0 %1609 }
 0x198   : > { %2488 = vmatmul.mubr.msk.bf16.vlgmr.msra.gmra.mrb[8].mxu1 %vm721_vm3, %v1102_v24 }
 0x199   : > { %2498 = vmatpush3.bf16.xpose.msra.mxu1 %v1236_v25  ;;  %2499 = vmatprep.mubr.msk.bf16.mxu1 %vm2754_vm1, %v2753_v2 }
 0x19a   : > { %2509 = vmatprep.subr.bf16.mxu1 %v2753_v2 }
 0x1a0   : > { %2500 = vmatmul.mubr.msk.bf16.vlgmr.msra.gmra.mrb[12].mxu1 %vm721_vm3, %v1229_v27 }
 0x1a1   : > { %2510 = vmatpush3.bf16.xpose.msra.mxu1 %v1363_v28  ;;  %2511 = vmatprep.mubr.msk.bf16.mxu1 %vm2754_vm1, %v2753_v2 }
 0x1a2   : > { %2521 = vmatprep.subr.bf16.mxu1 %v2753_v2 }
 0x1a8   : > { %2512 = vmatmul.mubr.msk.bf16.vlgmr.msra.gmra.mrb[16].mxu1 %vm721_vm3, %v1356_v30 }
 0x1a9   : > { %2522 = vmatpush3.bf16.xpose.msra.mxu1 %v1490_v31  ;;  %2523 = vmatprep.mubr.msk.bf16.mxu1 %vm2754_vm1, %v2753_v2 }
 0x1aa   : > { %2533 = vmatprep.subr.bf16.mxu1 %v2753_v2 }
 0x1b0   : > { %2524 = vmatmul.mubr.msk.bf16.vlgmr.msra.gmra.mrb[20].mxu1 %vm721_vm3, %v1483_v33 }
 0x1b1   : > { %2534 = vmatpush3.bf16.xpose.msra.mxu1 %v1617_v34  ;;  %2535 = vmatprep.mubr.msk.bf16.mxu1 %vm2754_vm1, %v2753_v2 }
 0x1b2   : > { %2545 = vmatprep.subr.bf16.mxu1 %v2753_v2 }
 0x1b8   : > { %2536 = vmatmul.mubr.msk.bf16.vlgmr.msra.gmra.mrb[24].mxu1 %vm721_vm3, %v1610_v35 }
 0x1b9   : > { %2549 = vmatprep.mubr.msk.bf16.mxu1 %vm2754_vm1, %v2753_v2 }
 0x24f   : > { %v762_v36 = vpop.f32.mrb[4].mxu0 }
 0x250   : > { %v3031_v37 = vmul.f32 0.5, %v762_v36  ;;  %v2453_v38 = vpop.f32.mrb[5].mxu0 }
 0x251   : > { %v765_v39 = vpop.f32.mrb[6].mxu0 }
 0x252   : > { %v2454_v40 = vpop.f32.mrb[7].mxu0  ;;  %v770_v41 = vsel %vm769_vm4, %v3031_v37, -inf }
 0x253   : > { %771 = vmax.xlane.f32.xlu1 %v770_v41 }
 0x25b   : > { %v891_v42 = vpop.f32.mrb[0].mxu1 }
 0x25c   : > { %v3035_v43 = vmul.f32 0.5, %v891_v42  ;;  %v2465_v44 = vpop.f32.mrb[1].mxu1 }
 0x25d   : > { %v894_v45 = vpop.f32.mrb[2].mxu1 }
 0x25e   : > { %v2466_v46 = vpop.f32.mrb[3].mxu1  ;;  %v898_v47 = vsel %vm769_vm4, %v3035_v43, -inf }
 0x25f   : > { %899 = vmax.xlane.f32.xlu0 %v898_v47 }
 0x263   : > { %v1018_v48 = vpop.f32.mrb[4].mxu1 }
 0x264   : > { %v1024_v49 = vmul.f32 0.5, %v1018_v48  ;;  %v2477_v50 = vpop.f32.mrb[5].mxu1 }
 0x265   : > { %v1021_v51 = vpop.f32.mrb[6].mxu1 }
 0x266   : > { %v2478_v52 = vpop.f32.mrb[7].mxu1  ;;  %v1025_v53 = vsel %vm769_vm4, %v1024_v49, -inf }
 0x267   : > { %1026 = vmax.xlane.f32.xlu0 %v1025_v53 }
 0x26b   : > { %v1145_v54 = vpop.f32.mrb[8].mxu1 }
 0x26c   : > { %v1151_v55 = vmul.f32 0.5, %v1145_v54  ;;  %v2489_v56 = vpop.f32.mrb[9].mxu1 }
 0x26d   : > { %v1148_v57 = vpop.f32.mrb[10].mxu1 }
 0x26e   : > { %v2490_v58 = vpop.f32.mrb[11].mxu1  ;;  %v1152_v59 = vsel %vm769_vm4, %v1151_v55, -inf }
 0x26f   : > { %1153 = vmax.xlane.f32.xlu1 %v1152_v59 }
 0x273   : > { %v1272_v60 = vpop.f32.mrb[12].mxu1 }
 0x274   : > { %v3041_v61 = vmul.f32 0.5, %v1272_v60  ;;  %v2501_v62 = vpop.f32.mrb[13].mxu1 }
 0x275   : > { %v1275_v63 = vpop.f32.mrb[14].mxu1 }
 0x276   : > { %v2502_v0 = vpop.f32.mrb[15].mxu1  ;;  %v1279_v1 = vsel %vm769_vm4, %v3041_v61, -inf }
 0x277   : > { %1280 = vmax.xlane.f32.xlu0 %v1279_v1 }
 0x27b   : > { %v1399_v3 = vpop.f32.mrb[16].mxu1 }
 0x27c   : > { %v3045_v5 = vmul.f32 0.5, %v1399_v3  ;;  %v2513_v6 = vpop.f32.mrb[17].mxu1 }
 0x27d   : > { %v1402_v7 = vpop.f32.mrb[18].mxu1 }
 0x27e   : > { %v2514_v8 = vpop.f32.mrb[19].mxu1  ;;  %v1406_v9 = vsel %vm769_vm4, %v3045_v5, -inf }
 0x27f   : > { %1407 = vmax.xlane.f32.xlu1 %v1406_v9 }
 0x283   : > { %v1526_v10 = vpop.f32.mrb[20].mxu1 }
 0x284   : > { %v3049_v12 = vmul.f32 0.5, %v1526_v10  ;;  %v2525_v13 = vpop.f32.mrb[21].mxu1 }
 0x285   : > { %v1529_v14 = vpop.f32.mrb[22].mxu1 }
 0x286   : > { %v2526_v15 = vpop.f32.mrb[23].mxu1  ;;  %v1533_v16 = vsel %vm769_vm4, %v3049_v12, -inf }
 0x287   : > { %1534 = vmax.xlane.f32.xlu0 %v1533_v16 }
 0x28b   : > { %v1653_v17 = vpop.f32.mrb[24].mxu1 }
 0x28c   : > { %v2537_v18 = vpop.f32.mrb[25].mxu1  ;;  %v3056_v21 = vmul.f32 0.5, %v1653_v17 }
 0x28d   : > { %v1656_v19 = vpop.f32.mrb[26].mxu1 }
 0x28e   : > { %v2538_v20 = vpop.f32.mrb[27].mxu1  ;;  %v1660_v22 = vsel %vm769_vm4, %v3056_v21, -inf }
 0x290   : > { %926 = vrot.lane.b32.xlu1 %v2973_v11, %s2770_s16  ;;  %s3276_s16 = scalar_lea.vmem %s3240_s4, %s2890_s15 }
 0x294   : > { %1053 = vrot.lane.b32.xlu1 %v2973_v11, %s2771_s19 }
 0x29d   : > { %798 = vrot.lane.b32.xlu0 %v2973_v11, %s2772_s23 }
 0x2b8   : > { %1661 = vmax.xlane.f32.xlu1 %v1660_v22 }
 0x2c9   : > { %1180 = vrot.lane.b32.xlu1 %v2973_v11, %s2773_s22  ;;  %s3277_s22 = scalar_lea.vmem %s3241_s5, %s2890_s15 }
 0x2e0   : > { %v772_v23 = vpop.xlane.xlu1 %771 }
 0x2e1   : > { %v773_v24 = vsub.f32 %v3031_v37, %v772_v23 }
 0x2e3   : > { %v774_v25 = vmul.f32 1.442695, %v773_v24 }
 0x2e5   : > { %2669 = vpow2.f32 %v774_v25 }
 0x2ec   : > { %v900_v26 = vpop.xlane.xlu0 %899 }
 0x2ed   : > { %v901_v27 = vsub.f32 %v3035_v43, %v900_v26 }
 0x2ef   : > { %v3063_v28 = vpop.eup %2669  ;;  %v902_v29 = vmul.f32 1.442695, %v901_v27 }
 0x2f0   : > { %v776_v30 = vsel %vm769_vm4, %v3063_v28, 0.0 }
 0x2f1   : > { %2671 = vpow2.f32 %v902_v29  ;;  %777 = vadd.xlane.f32.xlu0 %v776_v30 }
 0x2f4   : > { %v1027_v31 = vpop.xlane.xlu0 %1026 }
 0x2f5   : > { %v1028_v32 = vsub.f32 %v1024_v49, %v1027_v31 }
 0x2f7   : > { %v1029_v33 = vmul.f32 1.442695, %v1028_v32 }
 0x2f9   : > { %2673 = vpow2.f32 %v1029_v33 }
 0x2fb   : > { %v3067_v34 = vpop.eup %2671 }
 0x2fc   : > { %v1154_v35 = vpop.xlane.xlu1 %1153  ;;  %v904_v36 = vsel %vm769_vm4, %v3067_v34, 0.0 }
 0x2fd   : > { %v1155_v37 = vsub.f32 %v1151_v55, %v1154_v35  ;;  %905 = vadd.xlane.f32.xlu1 %v904_v36 }
 0x2ff   : > { %v1156_v38 = vmul.f32 1.442695, %v1155_v37 }
 0x301   : > { %2675 = vpow2.f32 %v1156_v38 }
 0x303   : > { %v3071_v39 = vpop.eup %2673 }
 0x304   : > { %v1031_v40 = vsel %vm769_vm4, %v3071_v39, 0.0  ;;  %v1281_v43 = vpop.xlane.xlu0 %1280 }
 0x305   : > { %1032 = vadd.xlane.f32.xlu0 %v1031_v40  ;;  %v1282_v47 = vsub.f32 %v3041_v61, %v1281_v43 }
 0x307   : > { %v1283_v48 = vmul.f32 1.442695, %v1282_v47 }
 0x309   : > { %2677 = vpow2.f32 %v1283_v48 }
 0x30b   : > { %v3075_v41 = vpop.eup %2675 }
 0x30c   : > { %v1158_v42 = vsel %vm769_vm4, %v3075_v41, 0.0  ;;  %v1408_v50 = vpop.xlane.xlu1 %1407 }
 0x30d   : > { %1159 = vadd.xlane.f32.xlu1 %v1158_v42  ;;  %v1409_v51 = vsub.f32 %v3045_v5, %v1408_v50 }
 0x30f   : > { %v1410_v53 = vmul.f32 1.442695, %v1409_v51 }
 0x310   : > { %v3087_v57 = vpop.permute.xlu1 %926 }
 0x313   : > { %v2678_v54 = vpop.eup %2677 }
 0x314   : > { %v1535_v44 = vpop.xlane.xlu0 %1534  ;;  %v1285_v55 = vsel %vm769_vm4, %v2678_v54, 0.0  ;;  %v3090_v60 = vpop.permute.xlu1 %1053 }
 0x315   : > { %v1536_v49 = vsub.f32 %v3049_v12, %v1535_v44  ;;  %v1059_v43 = vsel %vm803_vm5, %v3090_v60, 0 }
 0x317   : > { %v1537_v52 = vmul.f32 1.442695, %v1536_v49 }
 0x318   : > { %v799_v45 = vpop.permute.xlu0 %798 }
 0x319   : > { %v805_v46 = vsel %vm803_vm5, %v799_v45, 0  ;;  %2679 = vpow2.f32 %v1537_v52 }
 0x31a   : > { %2456 = vmatpush3.bf16.msra.mxu0 %v805_v46  ;;  %2681 = vpow2.f32 %v1410_v53 }
 0x31b   : > { %1307 = vrot.lane.b32.xlu0 %v2973_v11, %s2774_s26  ;;  %2467 = vmatprep.subr.bf16.mxu0 %v2753_v2 }
 0x31e   : > { %1434 = vrot.lane.b32.xlu1 %v2973_v11, %s2775_s17 }
 0x323   : > { %v2680_v56 = vpop.eup %2679 }
 0x324   : > { %v1539_v58 = vsel %vm769_vm4, %v2680_v56, 0.0  ;;  %v2682_v59 = vpop.eup %2681 }
 0x325   : > { %v1412_v61 = vsel %vm769_vm4, %v2682_v59, 0.0 }
 0x33a   : > { %1286 = vadd.xlane.f32.xlu0 %v1285_v55 }
 0x33e   : > { %1540 = vadd.xlane.f32.xlu0 %v1539_v58 }
 0x342   : > { %1413 = vadd.xlane.f32.xlu1 %v1412_v61 }
 0x345   : > { %v1662_v62 = vpop.xlane.xlu1 %1661 }
 0x346   : > { %v1663_v63 = vsub.f32 %v3056_v21, %v1662_v62 }
 0x348   : > { %v1664_v0 = vmul.f32 1.442695, %v1663_v63 }
 0x349   : > { %v3095_v6 = vpop.permute.xlu1 %1180 }
 0x34a   : > { %2683 = vpow2.f32 %v1664_v0  ;;  %v1186_v45 = vsel %vm803_vm5, %v3095_v6, 0 }
 0x354   : > { %v2684_v1 = vpop.eup %2683 }
 0x355   : > { %v1666_v3 = vsel %vm769_vm4, %v2684_v1, 0.0 }
 0x356   : > { %1667 = vadd.xlane.f32.xlu1 %v1666_v3 }
 0x37e   : > { %v778_v5 = vpop.xlane.xlu0 %777 }
 0x37f   : > { %2685 = vrcp.f32 %v778_v5 }
 0x389   : > { %v2686_v7 = vpop.eup %2685 }
 0x38a   : > { %v906_v8 = vpop.xlane.xlu1 %905  ;;  %v780_v9 = vmul.f32 %v2686_v7, %v3063_v28 }
 0x38b   : > { %2687 = vrcp.f32 %v906_v8 }
 0x38c   : > { %v781_v10 = vpack.c.bf16 %v780_v9, %v780_v9 }
 0x38e   : > { %782 = vxpose.xlu0.c.b16.start.end [1/1] (short) (narrow) %v781_v10, 16 }
 0x392   : > { %v1033_v12 = vpop.xlane.xlu0 %1032 }
 0x393   : > { %2689 = vrcp.f32 %v1033_v12 }
 0x395   : > { %v2688_v13 = vpop.eup %2687 }
 0x396   : > { %v908_v14 = vmul.f32 %v2688_v13, %v3067_v34  ;;  %v1308_v23 = vpop.permute.xlu0 %1307 }
 0x397   : > { %v1313_v47 = vsel %vm803_vm5, %v1308_v23, 0 }
 0x398   : > { %v909_v15 = vpack.c.bf16 %v908_v14, %v908_v14 }
 0x39a   : > { %910 = vxpose.xlu1.c.b16.start.end [1/1] (short) (narrow) %v909_v15, 16  ;;  %v1160_v16 = vpop.xlane.xlu1 %1159 }
 0x39b   : > { %2691 = vrcp.f32 %v1160_v16  ;;  %v2657_v16 = vld [vmem:[%s2906_s29] sm:$0xff]  }
 0x39c   : > { %2546 = vmatpush3.bf16.msra.mxu1 %v2657_v16 }
 0x39d   : > { %v2690_v17 = vpop.eup %2689  ;;  %2547 = vmatprep.subr.bf16.mxu1 %v2753_v2 }
 0x39e   : > { %v1035_v18 = vmul.f32 %v2690_v17, %v3071_v39  ;;  %v1435_v25 = vpop.permute.xlu1 %1434 }
 0x39f   : > { %v1440_v50 = vsel %vm803_vm5, %v1435_v25, 0 }
 0x3a0   : > { %v1036_v19 = vpack.c.bf16 %v1035_v18, %v1035_v18 }
 0x3a2   : > { %1037 = vxpose.xlu0.c.b16.start.end [1/1] (short) (narrow) %v1036_v19, 16 }
 0x3a5   : > { %v2692_v20 = vpop.eup %2691 }
 0x3a6   : > { %v1162_v21 = vmul.f32 %v2692_v20, %v3075_v41  ;;  %v932_v41 = vsel %vm803_vm5, %v3087_v57, 0 }
 0x3a8   : > { %v1163_v22 = vpack.c.bf16 %v1162_v21, %v1162_v21  ;;  %v2658_v21 = vld [vmem:[%s2906_s29 + $0x8] sm:$0xff]   ;;  %s3282_s29 = sld [smem:[#allocation3_spill]] }
 0x3a9   : > { %2548 = vmatpush3.bf16.msra.mxu1 %v2658_v21 }
 0x3aa   : > { %1164 = vxpose.xlu1.c.b16.start.end [1/1] (short) (narrow) %v1163_v22, 16  ;;  %2561 = vmatprep.subr.bf16.mxu1 %v2753_v2 }
 0x3ab   : > { %1561 = vrot.lane.b32.xlu0 %v2973_v11, %s2776_s18 }
 0x3ae   : > { %1688 = vrot.lane.b32.xlu1 %v2973_v11, %s2777_s12  ;;  %p2384_p8 = scmp.ne.s32.totalorder %s3282_s29, 1 }
 0x3c7   : > { %v1287_v24 = vpop.xlane.xlu0 %1286 }
 0x3c8   : > { %2693 = vrcp.f32 %v1287_v24 }
 0x3cb   : > { %v1541_v26 = vpop.xlane.xlu0 %1540 }
 0x3cc   : > { %2695 = vrcp.f32 %v1541_v26 }
 0x3cf   : > { %v1414_v27 = vpop.xlane.xlu1 %1413 }
 0x3d0   : > { %2697 = vrcp.f32 %v1414_v27 }
 0x3d2   : > { %v2694_v28 = vpop.eup %2693 }
 0x3d3   : > { %v1289_v29 = vmul.f32 %v2694_v28, %v2678_v54 }
 0x3d5   : > { %v1290_v30 = vpack.c.bf16 %v1289_v29, %v1289_v29 }
 0x3d6   : > { %v2696_v31 = vpop.eup %2695 }
 0x3d7   : > { %1291 = vxpose.xlu0.c.b16.start.end [1/1] (short) (narrow) %v1290_v30, 16  ;;  %v1543_v32 = vmul.f32 %v2696_v31, %v2680_v56 }
 0x3d9   : > { %v1544_v33 = vpack.c.bf16 %v1543_v32, %v1543_v32 }
 0x3da   : > { %v2698_v34 = vpop.eup %2697 }
 0x3db   : > { %1545 = vxpose.xlu0.c.b16.start.end [1/1] (short) (narrow) %v1544_v33, 16  ;;  %v1416_v35 = vmul.f32 %v2698_v34, %v2682_v59 }
 0x3dd   : > { %v1417_v36 = vpack.c.bf16 %v1416_v35, %v1416_v35 }
 0x3df   : > { %1418 = vxpose.xlu1.c.b16.start.end [1/1] (short) (narrow) %v1417_v36, 16 }
 0x3e3   : > { %v1668_v11 = vpop.xlane.xlu1 %1667 }
 0x3e4   : > { %2699 = vrcp.f32 %v1668_v11 }
 0x3ee   : > { %v2700_v37 = vpop.eup %2699 }
 0x3ef   : > { %v1670_v38 = vmul.f32 %v2700_v37, %v2684_v1 }
 0x3f1   : > { %v1671_v39 = vpack.c.bf16 %v1670_v38, %v1670_v38 }
 0x3f3   : > { %1672 = vxpose.xlu0.c.b16.start.end [1/1] (short) (narrow) %v1671_v39, 16 }
 0x3f4   : > { %v790_v40 = vpop.trf.xlu0 }
 0x3f5   : > { %2458 = vmatmul.mubr.msk.bf16.vlgmr.msra.gmra.mrb[8].mxu0 %vm769_vm4, %v790_v40 }
 0x3f6   : > { %2468 = vmatpush3.bf16.msra.mxu0 %v932_v41  ;;  %2469 = vmatprep.mubr.msk.bf16.mxu0 %vm2754_vm1, %v2753_v2 }
 0x3f7   : > { %2479 = vmatprep.subr.bf16.mxu0 %v2753_v2 }
 0x400   : > { %v918_v42 = vpop.trf.xlu1 }
 0x401   : > { %2470 = vmatmul.mubr.msk.bf16.vlgmr.msra.gmra.mrb[12].mxu0 %vm769_vm4, %v918_v42 }
 0x402   : > { %2480 = vmatpush3.bf16.msra.mxu0 %v1059_v43  ;;  %2481 = vmatprep.mubr.msk.bf16.mxu0 %vm2754_vm1, %v2753_v2 }
 0x403   : > { %2491 = vmatprep.subr.bf16.mxu0 %v2753_v2 }
 0x408   : > { %v1045_v44 = vpop.trf.xlu0 }
 0x409   : > { %2482 = vmatmul.mubr.msk.bf16.vlgmr.msra.gmra.mrb[16].mxu0 %vm769_vm4, %v1045_v44  ;;  %v2363_v44 = vld [vmem:[%s3276_s16] ss:$0 sm:$0xff] }
 0x40a   : > { %2492 = vmatpush3.bf16.msra.mxu0 %v1186_v45  ;;  %2493 = vmatprep.mubr.msk.bf16.mxu0 %vm2754_vm1, %v2753_v2 }
 0x40b   : > { %2503 = vmatprep.subr.bf16.mxu0 %v2753_v2 }
 0x410   : > { %v1172_v46 = vpop.trf.xlu1 }
 0x411   : > { %2494 = vmatmul.mubr.msk.bf16.vlgmr.msra.gmra.mrb[20].mxu0 %vm769_vm4, %v1172_v46 }
 0x412   : > { %2504 = vmatpush3.bf16.msra.mxu0 %v1313_v47  ;;  %2505 = vmatprep.mubr.msk.bf16.mxu0 %vm2754_vm1, %v2753_v2 }
 0x413   : > { %2515 = vmatprep.subr.bf16.mxu0 %v2753_v2 }
 0x41d   : > { %v1562_v48 = vpop.permute.xlu0 %1561 }
 0x41e   : > { %v1567_v53 = vsel %vm803_vm5, %v1562_v48, 0 }
 0x420   : > { %v1689_v51 = vpop.permute.xlu1 %1688 }
 0x421   : > { %v1694_v55 = vsel %vm803_vm5, %v1689_v51, 0 }
 0x43d   : > { %v1299_v49 = vpop.trf.xlu0 }
 0x43e   : > { %2506 = vmatmul.mubr.msk.bf16.vlgmr.msra.gmra.mrb[24].mxu0 %vm769_vm4, %v1299_v49 }
 0x43f   : > { %2516 = vmatpush3.bf16.msra.mxu0 %v1440_v50  ;;  %2517 = vmatprep.mubr.msk.bf16.mxu0 %vm2754_vm1, %v2753_v2 }
 0x440   : > { %2527 = vmatprep.subr.bf16.mxu0 %v2753_v2 }
 0x441   : > { %v1553_v54 = vpop.trf.xlu0 }
 0x445   : > { %v1426_v52 = vpop.trf.xlu1 }
 0x446   : > { %2518 = vmatmul.mubr.msk.bf16.vlgmr.msra.gmra.mrb[28].mxu0 %vm769_vm4, %v1426_v52 }
 0x447   : > { %2528 = vmatpush3.bf16.msra.mxu0 %v1567_v53  ;;  %2529 = vmatprep.mubr.msk.bf16.mxu0 %vm2754_vm1, %v2753_v2 }
 0x448   : > { %2539 = vmatprep.subr.bf16.mxu0 %v2753_v2 }
 0x44e   : > { %2530 = vmatmul.mubr.msk.bf16.vlgmr.msra.gmra.mrb[32].mxu0 %vm769_vm4, %v1553_v54 }
 0x44f   : > { %2540 = vmatpush3.bf16.msra.mxu0 %v1694_v55  ;;  %2541 = vmatprep.mubr.msk.bf16.mxu0 %vm2754_vm1, %v2753_v2 }
 0x450   : > { %2553 = vmatprep.subr.bf16.mxu0 %v2753_v2 }
 0x459   : > { %v1680_v56 = vpop.trf.xlu0 }
 0x45a   : > { %2542 = vmatmul.mubr.msk.bf16.vlgmr.msra.gmra.mrb[36].mxu0 %vm769_vm4, %v1680_v56 }
 0x45b   : > { %2557 = vmatprep.mubr.msk.bf16.mxu0 %vm2754_vm1, %v2753_v2 }
 0x4c8   : > { %v841_v57 = vpop.f32.mrb[8].mxu0 }
 0x4c9   : > { %v2459_v58 = vpop.f32.mrb[9].mxu0 }
 0x4ca   : > { %v844_v59 = vpop.f32.mrb[10].mxu0  ;;  %v2660_v58 = vld [vmem:[%s2923_s24 + $0x8] sm:$0xff]  }
 0x4cb   : > { %v2460_v60 = vpop.f32.mrb[11].mxu0 }
 0x4d4   : > { %v968_v61 = vpop.f32.mrb[12].mxu0 }
 0x4d5   : > { %1737 = vrot.lane.b32.xlu0 %v968_v61, %s2778_s21  ;;  %v2471_v62 = vpop.f32.mrb[13].mxu0  ;;  %s3279_s21 = sld [smem:[#allocation13_spill]] }
 0x4d6   : > { %v971_v63 = vpop.f32.mrb[14].mxu0  ;;  %v2367_v62 = vld [vmem:[%s3277_s22] ss:$0 sm:$0xff] }
 0x4d7   : > { %v2472_v0 = vpop.f32.mrb[15].mxu0 }
 0x4dc   : > { %v1095_v1 = vpop.f32.mrb[16].mxu0 }
 0x4dd   : > { %1741 = vrot.lane.b32.xlu1 %v1095_v1, %s2779_s20  ;;  %v2483_v3 = vpop.f32.mrb[17].mxu0  ;;  %s3280_s20 = scalar_lea.vmem %s3279_s21, %s2890_s15 }
 0x4de   : > { %v1098_v5 = vpop.f32.mrb[18].mxu0 }
 0x4df   : > { %v2484_v6 = vpop.f32.mrb[19].mxu0 }
 0x4e0   : > { %v2661_v6 = vld [vmem:[%s2937_s0] sm:$0xff]  }
 0x4e4   : > { %v1222_v7 = vpop.f32.mrb[20].mxu0 }
 0x4e5   : > { %1745 = vrot.lane.b32.xlu1 %v1222_v7, %s2780_s14  ;;  %v2495_v8 = vpop.f32.mrb[21].mxu0  ;;  %v2662_v7 = vld [vmem:[%s2937_s0 + $0x8] sm:$0xff]  }
 0x4e6   : > { %v1225_v9 = vpop.f32.mrb[22].mxu0  ;;  %v2663_v8 = vld [vmem:[%s2937_s0 + $0x10] sm:$0xff]  }
 0x4e7   : > { %v2496_v10 = vpop.f32.mrb[23].mxu0  ;;  %v2664_v9 = vld [vmem:[%s2937_s0 + $0x18] sm:$0xff]  }
 0x4e8   : > { %v2665_v10 = vld [vmem:[%s2937_s0 + $0x20] sm:$0xff]  }
 0x511   : > { %v1349_v12 = vpop.f32.mrb[24].mxu0 }
 0x512   : > { %1749 = vrot.lane.b32.xlu0 %v1349_v12, %s2781_s27  ;;  %v2507_v13 = vpop.f32.mrb[25].mxu0  ;;  %v2666_v12 = vld [vmem:[%s2937_s0 + $0x28] sm:$0xff]  }
 0x513   : > { %v1352_v14 = vpop.f32.mrb[26].mxu0  ;;  %v2667_v13 = vld [vmem:[%s2937_s0 + $0x30] sm:$0xff]  }
 0x514   : > { %v2508_v15 = vpop.f32.mrb[27].mxu0  ;;  %v2668_v14 = vld [vmem:[%s2937_s0 + $0x38] sm:$0xff]  }
 0x515   : > { %v2369_v15 = vld [vmem:[%s3280_s20] ss:$0 sm:$0xff] }
 0x519   : > { %v1476_v17 = vpop.f32.mrb[28].mxu0 }
 0x51a   : > { %1753 = vrot.lane.b32.xlu1 %v1476_v17, %s2782_s28  ;;  %v2519_v18 = vpop.f32.mrb[29].mxu0 }
 0x51b   : > { %v1479_v19 = vpop.f32.mrb[30].mxu0 }
 0x51c   : > { %v2520_v20 = vpop.f32.mrb[31].mxu0 }
 0x521   : > { %v1603_v22 = vpop.f32.mrb[32].mxu0 }
 0x522   : > { %1757 = vrot.lane.b32.xlu0 %v1603_v22, %s2783_s25  ;;  %v2531_v23 = vpop.f32.mrb[33].mxu0 }
 0x523   : > { %v1606_v24 = vpop.f32.mrb[34].mxu0 }
 0x524   : > { %v2532_v25 = vpop.f32.mrb[35].mxu0 }
 0x52d   : > { %v1730_v26 = vpop.f32.mrb[36].mxu0 }
 0x52e   : > { %1761 = vrot.lane.b32.xlu1 %v1730_v26, %s2784_s3  ;;  %v2543_v27 = vpop.f32.mrb[37].mxu0 }
 0x52f   : > { %v1733_v28 = vpop.f32.mrb[38].mxu0 }
 0x530   : > { %v2544_v29 = vpop.f32.mrb[39].mxu0 }
 0x547   : > { %v1738_v31 = vpop.permute.xlu0 %1737 }
 0x548   : > { %v1764_v34 = vsel %vm721_vm3, %v841_v57, %v1738_v31  ;;  %v2659_v57 = vld [vmem:[%s2923_s24] sm:$0xff]   ;;  %s3278_s24 = scalar_lea.vmem %s3242_s6, %s2890_s15 }
 0x549   : > { %2554 = vmatpush3.bf16.msra.mxu0 %v2659_v57  ;;  %v2368_v0 = vld [vmem:[%s3278_s24] ss:$0 sm:$0xff] }
 0x54a   : > { %2555 = vmatprep.subr.bf16.mxu0 %v2753_v2 }
 0x54d   : > { %2556 = vmatpush3.bf16.msra.mxu0 %v2660_v58 }
 0x54f   : > { %v1742_v30 = vpop.permute.xlu1 %1741 }
 0x550   : > { %v1765_v35 = vsel %vm769_vm4, %v1764_v34, %v1742_v30 }
 0x557   : > { %v1746_v32 = vpop.permute.xlu1 %1745 }
 0x558   : > { %v1767_v11 = vsel %vm1766_vm6, %v1765_v35, %v1746_v32 }
 0x584   : > { %v1750_v33 = vpop.permute.xlu0 %1749 }
 0x585   : > { %v1769_v38 = vsel %vm1768_vm7, %v1767_v11, %v1750_v33 }
 0x58c   : > { %v1754_v36 = vpop.permute.xlu1 %1753 }
 0x58d   : > { %v1771_v39 = vsel %vm1770_vm8, %v1769_v38, %v1754_v36 }
 0x594   : > { %v1758_v37 = vpop.permute.xlu0 %1757 }
 0x595   : > { %v1773_v40 = vsel %vm1772_vm9, %v1771_v39, %v1758_v37  ;;  %v2785_v39 = vmov 1.0  }
 0x5a0   : > { %v1762_v41 = vpop.permute.xlu1 %1761 }
 0x5a1   : > { %v1775_v42 = vsel %vm1774_vm10, %v1773_v40, %v1762_v41 }
 0x5a2   : > { %v1776_v43 = vpack.c.bf16 %v1775_v42, %v1775_v42 }
 0x5a4   : > { %2550 = vmatmul.mubr.msk.bf16.vlgmr.msra.gmra.mrb[28].mxu1 %vm673_vm2, %v1776_v43 }
 0x5a5   : > { %2577 = vmatprep.mubr.msk.bf16.mxu1 %vm2754_vm1, %v2753_v2  ;;  %2562 = vmatpush3.bf16.msra.mxu1 %v2661_v6 }
 0x5a6   : > { %2563 = vmatprep.subr.bf16.mxu1 %v2753_v2 }
 0x5a9   : > { %2564 = vmatpush3.bf16.msra.mxu1 %v2662_v7 }
 0x5aa   : > { %2565 = vmatprep.subr.bf16.mxu1 %v2753_v2 }
 0x5ad   : > { %2566 = vmatpush3.bf16.msra.mxu1 %v2663_v8 }
 0x5ae   : > { %2567 = vmatprep.subr.bf16.mxu1 %v2753_v2 }
 0x5b1   : > { %2568 = vmatpush3.bf16.msra.mxu1 %v2664_v9 }
 0x5b2   : > { %2569 = vmatprep.subr.bf16.mxu1 %v2753_v2 }
 0x5b5   : > { %2570 = vmatpush3.bf16.msra.mxu1 %v2665_v10 }
 0x5b6   : > { %2571 = vmatprep.subr.bf16.mxu1 %v2753_v2 }
 0x5b9   : > { %2572 = vmatpush3.bf16.msra.mxu1 %v2666_v12 }
 0x5ba   : > { %2573 = vmatprep.subr.bf16.mxu1 %v2753_v2 }
 0x5bd   : > { %2574 = vmatpush3.bf16.msra.mxu1 %v2667_v13 }
 0x5be   : > { %2575 = vmatprep.subr.bf16.mxu1 %v2753_v2 }
 0x5c1   : > { %2576 = vmatpush3.bf16.msra.mxu1 %v2668_v14 }
 0x677   : > { %v1837_v45 = vpop.f32.mrb[28].mxu1 }
 0x678   : > { %v1838_v46 = vadd.f32 %v2363_v44, %v1837_v45  ;;  %v2551_v47 = vpop.f32.mrb[29].mxu1 }
 0x679   : > { %v1840_v48 = vpop.f32.mrb[30].mxu1 }
 0x67a   : > { %v2552_v49 = vpop.f32.mrb[31].mxu1  ;;  %v1843_v50 = vadd.f32 %v1838_v46, %v2957_v4  ;;  %v2373_v46 = vld [vmem:[%s629_s13] ss:$0 sm:$0xff] }
 0x67c   : > { %v1846_v51 = vsel %vm673_vm2, %v1843_v50, 0.0 }
 0x67d   : > { %1847 = vadd.xlane.f32.xlu0 %v1846_v51 }
 0x70a   : > { %v1848_v52 = vpop.xlane.xlu0 %1847 }
 0x70b   : > { %v1850_v53 = vmul.f32 0.03125, %v1848_v52 }
 0x70d   : > { %v1851_v54 = vsub.f32 %v1843_v50, %v1850_v53 }
 0x70f   : > { %v1852_v55 = vmul.f32 %v1851_v54, %v1851_v54 }
 0x711   : > { %v1853_v56 = vsel %vm673_vm2, %v1852_v55, 0.0 }
 0x712   : > { %1854 = vadd.xlane.f32.xlu1 %v1853_v56 }
 0x79f   : > { %v1855_v4 = vpop.xlane.xlu1 %1854 }
 0x7a0   : > { %v1856_v59 = vmul.f32 0.03125, %v1855_v4 }
 0x7a2   : > { %v1857_v60 = vadd.f32 1e-05, %v1856_v59 }
 0x7a4   : > { %2701 = vrsqrt.f32 %v1857_v60 }
 0x7ae   : > { %v2702_v61 = vpop.eup %2701 }
 0x7af   : > { %v1859_v63 = vmul.f32 %v2702_v61, %v1851_v54 }
 0x7b1   : > { %v1866_v1 = vmul.f32 %v2367_v62, %v1859_v63 }
 0x7b3   : > { %v3174_v3 = vadd.f32 %v2368_v0, %v1866_v1 }
 0x7b5   : > { %v1874_v5 = vpack.c.bf16 %v3174_v3, %v3174_v3 }
 0x7b7   : > { %2558 = vmatmul.mubr.msk.bf16.vlgmr.msra.gmra.mrb[40].mxu0 %vm673_vm2, %v1874_v5 }
 0x88a   : > { %v1935_v16 = vpop.f32.mrb[40].mxu0 }
 0x88b   : > { %v1936_v17 = vadd.f32 %v2369_v15, %v1935_v16  ;;  %v2559_v18 = vpop.f32.mrb[41].mxu0 }
 0x88c   : > { %v1938_v19 = vpop.f32.mrb[42].mxu0 }
 0x88d   : > { %v1942_v20 = vmul.f32 0.70710677, %v1936_v17  ;;  %v2560_v21 = vpop.f32.mrb[43].mxu0  ;;  %v1941_v42 = vmul.f32 0.5, %v1936_v17 }
 0x88f   : > { %v1945_v22 = vand.u32 2147483647, %v1942_v20  ;;  %vm1943_vm11 = vcmp.lt.f32.partialorder %v1942_v20, 0.0 }
 0x890   : > { %v1944_v40 = vsel %vm1943_vm11, -1.0, %v2785_v39 }
 0x891   : > { %v1946_v23 = vmul.f32 0.3275911, %v1945_v22  ;;  %v1959_v25 = vsub.f32 0.0, %v1945_v22 }
 0x893   : > { %v1947_v24 = vadd.f32 1.0, %v1946_v23  ;;  %v1960_v2 = vmul.f32 %v1959_v25, %v1945_v22 }
 0x895   : > { %2703 = vrcp.f32 %v1947_v24  ;;  %v1961_v29 = vmul.f32 1.442695, %v1960_v2 }
 0x897   : > { %2705 = vpow2.f32 %v1961_v29 }
 0x89f   : > { %v2704_v26 = vpop.eup %2703 }
 0x8a0   : > { %v1950_v27 = vmul.f32 1.0614054, %v2704_v26 }
 0x8a1   : > { %v2706_v11 = vpop.eup %2705 }
 0x8a2   : > { %v1951_v28 = vadd.f32 -1.4531521, %v1950_v27  ;;  %v2383_v27 = vld [vmem:[%s635_s7] ss:$0 sm:$0xff] }
 0x8a4   : > { %v1952_v30 = vmul.f32 %v2704_v26, %v1951_v28 }
 0x8a6   : > { %v1953_v31 = vadd.f32 1.4214138, %v1952_v30 }
 0x8a8   : > { %v1954_v32 = vmul.f32 %v2704_v26, %v1953_v31 }
 0x8aa   : > { %v1955_v33 = vadd.f32 -0.28449672, %v1954_v32 }
 0x8ac   : > { %v1956_v34 = vmul.f32 %v2704_v26, %v1955_v33 }
 0x8ae   : > { %v1957_v35 = vadd.f32 0.2548296, %v1956_v34 }
 0x8b0   : > { %v1958_v36 = vmul.f32 %v2704_v26, %v1957_v35 }
 0x8b2   : > { %v1963_v37 = vmul.f32 %v2706_v11, %v1958_v36 }
 0x8b4   : > { %v1964_v38 = vsub.f32 1.0, %v1963_v37 }
 0x8b6   : > { %v1965_v41 = vmul.f32 %v1964_v38, %v1944_v40 }
 0x8b8   : > { %v1966_v43 = vadd.f32 1.0, %v1965_v41 }
 0x8ba   : > { %v1967_v44 = vmul.f32 %v1966_v43, %v1941_v42 }
 0x8bc   : > { %v1968_v45 = vpack.c.bf16 %v1967_v44, %v1967_v44 }
 0x8be   : > { %2578 = vmatmul.mubr.bf16.vlgmr.msra.gmra.mrb[32].mxu1 %v1968_v45 }
 0x991   : > { %v2074_v47 = vpop.f32.mrb[32].mxu1 }
 0x992   : > { %v2075_v48 = vadd.f32 %v2373_v46, %v2074_v47  ;;  %v2579_v49 = vpop.f32.mrb[33].mxu1 }
 0x993   : > { %v2077_v50 = vpop.f32.mrb[34].mxu1 }
 0x994   : > { %v2081_v51 = vmul.f32 0.70710677, %v2075_v48  ;;  %v2580_v52 = vpop.f32.mrb[35].mxu1  ;;  %v2080_v13 = vmul.f32 0.5, %v2075_v48 }
 0x996   : > { %v2084_v53 = vand.u32 2147483647, %v2081_v51  ;;  %vm2082_vm12 = vcmp.lt.f32.partialorder %v2081_v51, 0.0 }
 0x997   : > { %v2083_v10 = vsel %vm2082_vm12, -1.0, %v2785_v39 }
 0x998   : > { %v2085_v54 = vmul.f32 0.3275911, %v2084_v53  ;;  %v2098_v56 = vsub.f32 0.0, %v2084_v53 }
 0x99a   : > { %v2086_v55 = vadd.f32 1.0, %v2085_v54  ;;  %v2099_v58 = vmul.f32 %v2098_v56, %v2084_v53 }
 0x99c   : > { %2707 = vrcp.f32 %v2086_v55  ;;  %v2100_v60 = vmul.f32 1.442695, %v2099_v58 }
 0x99e   : > { %2709 = vpow2.f32 %v2100_v60 }
 0x9a6   : > { %v2708_v57 = vpop.eup %2707 }
 0x9a7   : > { %v2089_v4 = vmul.f32 1.0614054, %v2708_v57 }
 0x9a8   : > { %v2710_v7 = vpop.eup %2709 }
 0x9a9   : > { %v2090_v59 = vadd.f32 -1.4531521, %v2089_v4 }
 0x9ab   : > { %v2091_v61 = vmul.f32 %v2708_v57, %v2090_v59 }
 0x9ad   : > { %v2092_v62 = vadd.f32 1.4214138, %v2091_v61 }
 0x9af   : > { %v2093_v63 = vmul.f32 %v2708_v57, %v2092_v62 }
 0x9b1   : > { %v2094_v0 = vadd.f32 -0.28449672, %v2093_v63 }
 0x9b3   : > { %v2095_v1 = vmul.f32 %v2708_v57, %v2094_v0 }
 0x9b5   : > { %v2096_v5 = vadd.f32 0.2548296, %v2095_v1 }
 0x9b7   : > { %v2097_v6 = vmul.f32 %v2708_v57, %v2096_v5 }
 0x9b9   : > { %v2102_v8 = vmul.f32 %v2710_v7, %v2097_v6 }
 0x9bb   : > { %v2103_v9 = vsub.f32 1.0, %v2102_v8 }
 0x9bd   : > { %v2104_v12 = vmul.f32 %v2103_v9, %v2083_v10 }
 0x9bf   : > { %v2105_v14 = vadd.f32 1.0, %v2104_v12 }
 0x9c1   : > { %v2106_v15 = vmul.f32 %v2105_v14, %v2080_v13 }
 0x9c3   : > { %v2107_v16 = vadd.f32 %v2106_v15, %v3174_v3  ;;  %v2382_v3 = vld [vmem:[%s632_s1] ss:$0 sm:$0xff] }
 0x9c5   : > { %v2110_v17 = vsel %vm673_vm2, %v2107_v16, 0.0 }
 0x9c6   : > { %2111 = vadd.xlane.f32.xlu0 %v2110_v17 }
 0xa53   : > { %v2112_v18 = vpop.xlane.xlu0 %2111 }
 0xa54   : > { %v2113_v19 = vmul.f32 0.03125, %v2112_v18 }
 0xa56   : > { %v2114_v20 = vsub.f32 %v2107_v16, %v2113_v19 }
 0xa58   : > { %v2115_v21 = vmul.f32 %v2114_v20, %v2114_v20 }
 0xa5a   : > { %v2116_v22 = vsel %vm673_vm2, %v2115_v21, 0.0 }
 0xa5b   : > { %2117 = vadd.xlane.f32.xlu0 %v2116_v22 }
 0xae8   : > { %v2118_v23 = vpop.xlane.xlu0 %2117 }
 0xae9   : > { %v2119_v24 = vmul.f32 0.03125, %v2118_v23 }
 0xaeb   : > { %v2120_v25 = vadd.f32 1e-05, %v2119_v24 }
 0xaed   : > { %2711 = vrsqrt.f32 %v2120_v25 }
 0xaf7   : > { %v2712_v26 = vpop.eup %2711 }
 0xaf8   : > { %v2122_v2 = vmul.f32 %v2712_v26, %v2114_v20  ;;  %2141 = sbr.rel (%p2384_p8) target bundleno = 2815 (0xaff), region = 80 }
 0xafa   : > { %v2129_v28 = vmul.f32 %v2382_v3, %v2122_v2 }
 0xafc   : > { %v2136_v29 = vadd.f32 %v2383_v27, %v2129_v28 }
 0xafe   : > { %2137 = vst.msk [vmem:[#allocation2] sm:$0xff] %vm673_vm2, %v2136_v29  ;;  %2142 = vst.msk [vmem:[%s2950_s8] sm:$0xff] (!%p2384_p8), %vm673_vm2, %v2136_v29 }
 0xaff PF: > { %s3283_s30 = sld [smem:[#allocation6_spill]]  ;;  %s3284_s25 = sld [smem:[#allocation4_spill]] }
 0xb00   : > { %s3285_s26 = sld [smem:[#allocation5_spill]]  ;;  %s3286_s27 = sld [smem:[#allocation7_spill]] }
 0xb01   : > { %s3287_s28 = sld [smem:[#allocation8_spill]] }
 0xb05   : > { %s23_s29 = sadd.s32 1, %s3283_s30  }
 0xb06   : > { %p20_p9 = scmp.ge.s32.totalorder %s23_s29, 6  }
 0xb08   :  { %22 = sbr.rel (!%p20_p9) target bundleno = 8 (0x8), region = 146 }

</bundles_post_ra>
